<compile_context>
chip_gen: v7x
topology: tpu7x:2x2x1
jax: 0.10.0
libtpu: 0.0.40
codegen_flags: <defaults>
</compile_context>

<pallas_src>
import functools

import jax
import jax.numpy as jnp
from jax.experimental import pallas as pl
from jax.experimental.pallas import tpu as pltpu


def _round_up(x, m):
    return ((x + m - 1) // m) * m


# ----------------------------------------------------------------------------
# Pallas kernel 1: tiled GEMM  O = A @ B + bias  (+ optional ReLU)
#   A: (M, K) bf16, B: (K, N) bf16, bias: (M, 1) f32 broadcast over lanes.
# ----------------------------------------------------------------------------
def _gemm_kernel(a_ref, b_ref, bias_ref, o_ref, acc_ref, *, activation):
    k = pl.program_id(2)

    @pl.when(k == 0)
    def _init():
        acc_ref[...] = jnp.zeros_like(acc_ref)

    acc_ref[...] += jnp.dot(a_ref[...], b_ref[...],
                            preferred_element_type=jnp.float32)

    @pl.when(k == pl.num_programs(2) - 1)
    def _finalize():
        acc = acc_ref[...] + bias_ref[...]          # f32 epilogue on the VPU
        if activation == "relu":
            acc = jnp.maximum(acc, 0.0)
        o_ref[...] = acc.astype(o_ref.dtype)


def pallas_gemm(a, b, bias_col=None, activation=None,
                tm_cap=256, tn_cap=512, tk_cap=512):
    """O = A @ B + bias_col (broadcast along N), bf16 MXU inputs, f32 out."""
    M, K = a.shape
    K2, N = b.shape
    assert K == K2
    if bias_col is None:
        bias_col = jnp.zeros((M, 1), jnp.float32)
    bias_col = bias_col.astype(jnp.float32).reshape(M, 1)

    a = a.astype(jnp.bfloat16)
    b = b.astype(jnp.bfloat16)

    tm = tm_cap if M > tm_cap else _round_up(M, 8)
    tn = tn_cap if N > tn_cap else _round_up(N, 128)
    tk = tk_cap if K > tk_cap else _round_up(K, 128)
    Mp, Np, Kp = _round_up(M, tm), _round_up(N, tn), _round_up(K, tk)

    if (Mp, Kp) != (M, K):
        a = jnp.pad(a, ((0, Mp - M), (0, Kp - K)))
    if (Kp, Np) != (K, N):
        b = jnp.pad(b, ((0, Kp - K), (0, Np - N)))
    if Mp != M:
        bias_col = jnp.pad(bias_col, ((0, Mp - M), (0, 0)))

    grid = (Mp // tm, Np // tn, Kp // tk)
    out = pl.pallas_call(
        functools.partial(_gemm_kernel, activation=activation),
        out_shape=jax.ShapeDtypeStruct((Mp, Np), jnp.float32),
        grid=grid,
        in_specs=[
            pl.BlockSpec((tm, tk), lambda i, j, k: (i, k)),
            pl.BlockSpec((tk, tn), lambda i, j, k: (k, j)),
            pl.BlockSpec((tm, 1), lambda i, j, k: (i, 0)),
        ],
        out_specs=pl.BlockSpec((tm, tn), lambda i, j, k: (i, j)),
        scratch_shapes=[pltpu.VMEM((tm, tn), jnp.float32)],
        compiler_params=pltpu.CompilerParams(
            dimension_semantics=("parallel", "parallel", "arbitrary")),
        cost_estimate=pl.CostEstimate(
            flops=2 * M * N * K,
            transcendentals=0,
            bytes_accessed=Mp * Kp * 2 + Kp * Np * 2 + Mp * Np * 4 + Mp * 4),
    )(a, b, bias_col)
    return out[:M, :N]


# ----------------------------------------------------------------------------
# Pallas kernel 2: fused latent block
#   mu = h @ Wmu + bmu ; logvar = h @ Wlv + blv
#   z  = mu + eps * exp(0.5*logvar)
#   dh = relu(z @ Wd + bd)
# ----------------------------------------------------------------------------
def _latent_kernel(h_ref, wmu_ref, bmu_ref, wlv_ref, blv_ref, eps_ref,
                   dw_ref, db_ref, mu_ref, lv_ref, dh_ref):
    h = h_ref[...]
    mu = jnp.dot(h, wmu_ref[...], preferred_element_type=jnp.float32) + bmu_ref[...]
    lv = jnp.dot(h, wlv_ref[...], preferred_element_type=jnp.float32) + blv_ref[...]
    z = mu + eps_ref[...] * jnp.exp(0.5 * lv)         # exp -> EUP slot
    dh = jnp.dot(z, dw_ref[...], preferred_element_type=jnp.float32) + db_ref[...]
    mu_ref[...] = mu
    lv_ref[...] = lv
    dh_ref[...] = jnp.maximum(dh, 0.0)


def pallas_latent(h_flat, w_mu, b_mu, w_lv, b_lv, eps, d_w, d_b):
    B, F = h_flat.shape
    nl = w_mu.shape[1]
    DF = d_w.shape[1]

    def full(shape):
        return pl.BlockSpec(shape, lambda i, _s=shape: (0,) * len(_s))

    return pl.pallas_call(
        _latent_kernel,
        out_shape=(jax.ShapeDtypeStruct((B, nl), jnp.float32),
                   jax.ShapeDtypeStruct((B, nl), jnp.float32),
                   jax.ShapeDtypeStruct((B, DF), jnp.float32)),
        grid=(1,),
        in_specs=[full((B, F)), full((F, nl)), full((1, nl)),
                  full((F, nl)), full((1, nl)), full((B, nl)),
                  full((nl, DF)), full((1, DF))],
        out_specs=(full((B, nl)), full((B, nl)), full((B, DF))),
    )(h_flat, w_mu, b_mu.reshape(1, nl), w_lv, b_lv.reshape(1, nl),
      eps, d_w, d_b.reshape(1, DF))


# ----------------------------------------------------------------------------
# Plain-JAX glue: im2col (patch layout already GEMM-transposed), col2im
# ----------------------------------------------------------------------------
def _im2col_t(x_nchw, kh, kw, stride, pad):
    """Returns patches of shape (Cin*kh*kw, N*Hout*Wout), Hout, Wout."""
    N, C, H, W = x_nchw.shape
    xp = jnp.pad(x_nchw, ((0, 0), (0, 0), (pad, pad), (pad, pad)))
    Hout = (H + 2 * pad - kh) // stride + 1
    Wout = (W + 2 * pad - kw) // stride + 1
    pieces = []
    for i in range(kh):
        for j in range(kw):
            pieces.append(
                xp[:, :, i:i + stride * Hout:stride, j:j + stride * Wout:stride])
    p = jnp.stack(pieces, axis=2)          # (N, C, kh*kw, Hout, Wout)
    p = p.transpose(1, 2, 0, 3, 4)         # (C, kh*kw, N, Hout, Wout)
    return p.reshape(C * kh * kw, N * Hout * Wout), Hout, Wout


def conv2d(x_nchw, weight, bias, stride, pad, activation=None):
    """PyTorch Conv2d semantics. weight: (Cout, Cin, kh, kw)."""
    Cout, Cin, kh, kw = weight.shape
    N = x_nchw.shape[0]
    patches_t, Hout, Wout = _im2col_t(x_nchw, kh, kw, stride, pad)   # (K, M)
    a = weight.reshape(Cout, Cin * kh * kw)                          # (Cout, K)
    # lane-dense output: (Cout, N*Hout*Wout)
    y = pallas_gemm(a, patches_t, bias.reshape(Cout, 1), activation=activation)
    return y.reshape(Cout, N, Hout, Wout).transpose(1, 0, 2, 3)


def conv_transpose2d(x_nchw, weight, bias, stride, pad, activation=None):
    """PyTorch ConvTranspose2d semantics. weight: (Cin, Cout, kh, kw).

    Lowered as GEMM on the undilated input + col2im scatter-add (no 75%-zero
    dilated-input work). Bias/ReLU are applied after col2im (contributions
    from different taps are summed, so they cannot live in the GEMM epilogue).
    """
    Cin, Cout, kh, kw = weight.shape
    N, C, H, W = x_nchw.shape
    assert C == Cin
    Hout = (H - 1) * stride - 2 * pad + kh
    Wout = (W - 1) * stride - 2 * pad + kw

    x2d = x_nchw.reshape(N, Cin, H * W).transpose(1, 0, 2).reshape(Cin, N * H * W)
    a = weight.reshape(Cin, Cout * kh * kw).T                        # (Cout*kh*kw, Cin)
    cols = pallas_gemm(a, x2d)                                        # (Cout*kh*kw, N*H*W)
    cols = cols.reshape(Cout, kh, kw, N, H, W)

    Hfull = (H - 1) * stride + kh
    Wfull = (W - 1) * stride + kw
    out = jnp.zeros((N, Cout, Hfull, Wfull), jnp.float32)
    for i in range(kh):
        for j in range(kw):
            out = out.at[:, :,
                         i:i + stride * (H - 1) + 1:stride,
                         j:j + stride * (W - 1) + 1:stride].add(
                cols[:, i, j].transpose(1, 0, 2, 3))
    out = out[:, :, pad:pad + Hout, pad:pad + Wout]
    out = out + bias.reshape(1, Cout, 1, 1)
    if activation == "relu":
        out = jnp.maximum(out, 0.0)
    return out


# ----------------------------------------------------------------------------
# Parameters & forward
# ----------------------------------------------------------------------------
def init_params(key, in_ch, n_latent, hid1=16, hid2=32, spatial=16):
    ks = jax.random.split(key, 12)
    s4 = spatial // 4
    flat = hid2 * s4 * s4
    scale = 0.05

    def nrm(k, shape):
        return scale * jax.random.normal(k, shape, dtype=jnp.float32)

    return {
        # encoder
        "e_conv1_w": nrm(ks[0], (hid1, in_ch, 4, 4)),
        "e_conv1_b": nrm(ks[1], (hid1,)),
        "e_conv2_w": nrm(ks[2], (hid2, hid1, 4, 4)),
        "e_conv2_b": nrm(ks[3], (hid2,)),
        "e_fc_w": nrm(ks[4], (flat, 2 * n_latent)),
        "e_fc_b": nrm(ks[5], (2 * n_latent,)),
        # decoder
        "d_fc_w": nrm(ks[6], (n_latent, flat)),
        "d_fc_b": nrm(ks[7], (flat,)),
        "d_deconv1_w": nrm(ks[8], (hid2, hid1, 4, 4)),   # ConvTranspose (Cin,Cout,kh,kw)
        "d_deconv1_b": nrm(ks[9], (hid1,)),
        "d_deconv2_w": nrm(ks[10], (hid1, in_ch, 4, 4)),
        "d_deconv2_b": nrm(ks[11], (in_ch,)),
    }


def conv_vae_forward(params, x, eps, n_latent, hid2=32):
    """Forward pass of ConvVAE: returns (x_recon, mu_z, logvar_z)."""
    N = x.shape[0]
    # ---- encoder convs (Pallas tiled GEMM) ----
    h = conv2d(x, params["e_conv1_w"], params["e_conv1_b"], 2, 1, activation="relu")
    h = conv2d(h, params["e_conv2_w"], params["e_conv2_b"], 2, 1, activation="relu")
    h_flat = h.reshape(N, -1)
    # ---- fused latent block: enc FC + reparameterize + dec FC+ReLU ----
    w_mu = params["e_fc_w"][:, :n_latent]
    w_lv = params["e_fc_w"][:, n_latent:]
    b_mu = params["e_fc_b"][:n_latent]
    b_lv = params["e_fc_b"][n_latent:]
    mu_z, logvar_z, d = pallas_latent(h_flat, w_mu, b_mu, w_lv, b_lv, eps,
                                      params["d_fc_w"], params["d_fc_b"])
    # ---- decoder deconvs (Pallas GEMM on undilated input + col2im) ----
    s4 = x.shape[2] // 4
    d = d.reshape(N, hid2, s4, s4)
    d = conv_transpose2d(d, params["d_deconv1_w"], params["d_deconv1_b"], 2, 1,
                         activation="relu")
    x_recon = conv_transpose2d(d, params["d_deconv2_w"], params["d_deconv2_b"], 2, 1)
    return x_recon, mu_z, logvar_z


# ----------------------------------------------------------------------------
# Pure-JAX f32 reference (for a loose numerical sanity check)
# ----------------------------------------------------------------------------
def _ref_forward(params, x, eps, n_latent, hid2=32):
    def conv(x, w, b, s, p):
        y = jax.lax.conv_general_dilated(
            x, w, (s, s), ((p, p), (p, p)),
            dimension_numbers=("NCHW", "OIHW", "NCHW"))
        return y + b.reshape(1, -1, 1, 1)

    def deconv(x, w, b, s, p):
        k = w.shape[2]
        wf = jnp.flip(w.transpose(1, 0, 2, 3), axis=(2, 3))
        y = jax.lax.conv_general_dilated(
            x, wf, (1, 1), ((k - 1 - p, k - 1 - p), (k - 1 - p, k - 1 - p)),
            lhs_dilation=(s, s),
            dimension_numbers=("NCHW", "OIHW", "NCHW"))
        return y + b.reshape(1, -1, 1, 1)

    relu = lambda t: jnp.maximum(t, 0.0)
    N = x.shape[0]
    h = relu(conv(x, params["e_conv1_w"], params["e_conv1_b"], 2, 1))
    h = relu(conv(h, params["e_conv2_w"], params["e_conv2_b"], 2, 1))
    stats = h.reshape(N, -1) @ params["e_fc_w"] + params["e_fc_b"]
    mu, logvar = stats[:, :n_latent], stats[:, n_latent:]
    z = mu + eps * jnp.exp(0.5 * logvar)
    d = relu(z @ params["d_fc_w"] + params["d_fc_b"])
    d = d.reshape(N, hid2, x.shape[2] // 4, x.shape[2] // 4)
    d = relu(deconv(d, params["d_deconv1_w"], params["d_deconv1_b"], 2, 1))
    xr = deconv(d, params["d_deconv2_w"], params["d_deconv2_b"], 2, 1)
    return xr, mu, logvar


def _close(a, b, rtol, atol):
    return bool(jnp.all(jnp.abs(a - b) <= atol + rtol * jnp.abs(b)))


if __name__ == "__main__":
    batch, in_ch, spatial, n_latent = 2, 4, 16, 32
    key = jax.random.PRNGKey(0)
    k_x, k_eps, k_p = jax.random.split(key, 3)

    x = jax.random.normal(k_x, (batch, in_ch, spatial, spatial), dtype=jnp.float32)
    eps = jax.random.normal(k_eps, (batch, n_latent), dtype=jnp.float32)
    params = init_params(k_p, in_ch, n_latent, spatial=spatial)

    fwd = jax.jit(functools.partial(conv_vae_forward, n_latent=n_latent))
    x_recon, mu_z, logvar_z = fwd(params, x, eps)
    jax.block_until_ready((x_recon, mu_z, logvar_z))

    assert x_recon.shape == x.shape
    assert mu_z.shape == (batch, n_latent)
    assert logvar_z.shape == (batch, n_latent)
    assert bool(jnp.all(jnp.isfinite(x_recon)))

    # Loose-tolerance check vs f32 reference (Pallas conv GEMMs use bf16 MXU inputs).
    xr_ref, mu_ref, lv_ref = _ref_forward(params, x, eps, n_latent)
    assert _close(mu_z, mu_ref, 0.1, 3e-3), "mu mismatch"
    assert _close(logvar_z, lv_ref, 0.1, 3e-3), "logvar mismatch"
    assert _close(x_recon, xr_ref, 0.1, 3e-3), "recon mismatch"

    print("KERNEL_OK")
</pallas_src>

<mosaic_0001>
module attributes {stable_mosaic.version = 11 : i64} {
  func.func @_gemm_kernel(%arg0: i32, %arg1: i32, %arg2: i32, %arg3: memref<16x128xbf16, #tpu.memory_space<vmem>>, %arg4: memref<128x128xbf16, #tpu.memory_space<vmem>>, %arg5: memref<16x1xf32, #tpu.memory_space<vmem>>, %arg6: memref<16x128xf32, #tpu.memory_space<vmem>>, %arg7: memref<16x128xf32, #tpu.memory_space<vmem>>) attributes {dimension_semantics = [#tpu.dimension_semantics<parallel>, #tpu.dimension_semantics<parallel>, #tpu.dimension_semantics<arbitrary>], iteration_bounds = array<i64: 1, 1, 1>, scalar_prefetch = 0 : i64, scratch_operands = 1 : i64, tpu.core_type = #tpu.core_type<tc>, window_params = [{transform_indices = @transform_0, window_bounds = array<i64: 16, 128>}, {transform_indices = @transform_1, window_bounds = array<i64: 128, 128>}, {transform_indices = @transform_2, window_bounds = array<i64: 16, 1>}, {transform_indices = @transform_3, window_bounds = array<i64: 16, 128>}]} {
    %c0_i32 = arith.constant 0 : i32
    %0 = arith.cmpi eq, %arg2, %c0_i32 : i32
    %1 = arith.extui %0 : i1 to i32
    %c0_i32_0 = arith.constant 0 : i32
    %2 = arith.cmpi ne, %1, %c0_i32_0 : i32
    scf.if %2 {
      %cst_10 = arith.constant 0.000000e+00 : f32
      %12 = vector.broadcast %cst_10 : f32 to vector<16x128xf32>
      %c0_11 = arith.constant 0 : index
      %c0_12 = arith.constant 0 : index
      %13 = vector.load %arg7[%c0_11, %c0_12] : memref<16x128xf32, #tpu.memory_space<vmem>>, vector<16x128xf32>
      tpu.vector_store %arg7[%c0_11, %c0_12], %12 {strides = array<i32>} : memref<16x128xf32, #tpu.memory_space<vmem>>, vector<16x128xf32>,
    } else {
    }
    %c0 = arith.constant 0 : index
    %c0_1 = arith.constant 0 : index
    %3 = vector.load %arg7[%c0, %c0_1] : memref<16x128xf32, #tpu.memory_space<vmem>>, vector<16x128xf32>
    %c0_2 = arith.constant 0 : index
    %c0_3 = arith.constant 0 : index
    %4 = vector.load %arg3[%c0_2, %c0_3] : memref<16x128xbf16, #tpu.memory_space<vmem>>, vector<16x128xbf16>
    %c0_4 = arith.constant 0 : index
    %c0_5 = arith.constant 0 : index
    %5 = vector.load %arg4[%c0_4, %c0_5] : memref<128x128xbf16, #tpu.memory_space<vmem>>, vector<128x128xbf16>
    %cst = arith.constant dense<0.000000e+00> : vector<16x128xf32>
    %6 = tpu.matmul %4, %5, %cst {dimension_numbers = #tpu.dot_dimension_numbers<[1], [0], [0], [1], [0, 0, 1, 1], [], []>} : vector<16x128xbf16>, vector<128x128xbf16>, vector<16x128xf32> -> vector<16x128xf32>
    %7 = arith.addf %3, %6 : vector<16x128xf32>
    %c0_6 = arith.constant 0 : index
    %c0_7 = arith.constant 0 : index
    %8 = vector.load %arg7[%c0_6, %c0_7] : memref<16x128xf32, #tpu.memory_space<vmem>>, vector<16x128xf32>
    tpu.vector_store %arg7[%c0_6, %c0_7], %7 {strides = array<i32>} : memref<16x128xf32, #tpu.memory_space<vmem>>, vector<16x128xf32>,
    %c0_i32_8 = arith.constant 0 : i32
    %9 = arith.cmpi eq, %arg2, %c0_i32_8 : i32
    %10 = arith.extui %9 : i1 to i32
    %c0_i32_9 = arith.constant 0 : i32
    %11 = arith.cmpi ne, %10, %c0_i32_9 : i32
    scf.if %11 {
      %c0_10 = arith.constant 0 : index
      %c0_11 = arith.constant 0 : index
      %12 = vector.load %arg7[%c0_10, %c0_11] : memref<16x128xf32, #tpu.memory_space<vmem>>, vector<16x128xf32>
      %c0_12 = arith.constant 0 : index
      %c0_13 = arith.constant 0 : index
      %13 = vector.load %arg5[%c0_12, %c0_13] : memref<16x1xf32, #tpu.memory_space<vmem>>, vector<16x1xf32>
      %14 = vector.broadcast %13 : vector<16x1xf32> to vector<16x128xf32>
      %15 = arith.addf %12, %14 : vector<16x128xf32>
      %cst_14 = arith.constant 0.000000e+00 : f32
      %16 = vector.broadcast %cst_14 : f32 to vector<16x128xf32>
      %17 = arith.maximumf %15, %16 : vector<16x128xf32>
      %c0_15 = arith.constant 0 : index
      %c0_16 = arith.constant 0 : index
      %18 = vector.load %arg6[%c0_15, %c0_16] : memref<16x128xf32, #tpu.memory_space<vmem>>, vector<16x128xf32>
      tpu.vector_store %arg6[%c0_15, %c0_16], %17 {strides = array<i32>} : memref<16x128xf32, #tpu.memory_space<vmem>>, vector<16x128xf32>,
    } else {
    }
    return
  }
  func.func @transform_0(%arg0: i32, %arg1: i32, %arg2: i32) -> (i32, i32) {
    %c0_i32 = arith.constant 0 : i32
    return %arg0, %arg2 : i32, i32
  }
  func.func @transform_1(%arg0: i32, %arg1: i32, %arg2: i32) -> (i32, i32) {
    %c0_i32 = arith.constant 0 : i32
    return %arg2, %arg1 : i32, i32
  }
  func.func @transform_2(%arg0: i32, %arg1: i32, %arg2: i32) -> (i32, i32) {
    %c0_i32 = arith.constant 0 : i32
    %c0_i32_0 = arith.constant 0 : i32
    return %arg0, %c0_i32 : i32, i32
  }
  func.func @transform_3(%arg0: i32, %arg1: i32, %arg2: i32) -> (i32, i32) {
    %c0_i32 = arith.constant 0 : i32
    return %arg0, %arg1 : i32, i32
  }
}

module attributes {stable_mosaic.version = 11 : i64} {
  func.func @_gemm_kernel(%arg0: i32, %arg1: i32, %arg2: i32, %arg3: memref<32x256xbf16, #tpu.memory_space<vmem>>, %arg4: memref<256x128xbf16, #tpu.memory_space<vmem>>, %arg5: memref<32x1xf32, #tpu.memory_space<vmem>>, %arg6: memref<32x128xf32, #tpu.memory_space<vmem>>, %arg7: memref<32x128xf32, #tpu.memory_space<vmem>>) attributes {dimension_semantics = [#tpu.dimension_semantics<parallel>, #tpu.dimension_semantics<parallel>, #tpu.dimension_semantics<arbitrary>], iteration_bounds = array<i64: 1, 1, 1>, scalar_prefetch = 0 : i64, scratch_operands = 1 : i64, tpu.core_type = #tpu.core_type<tc>, window_params = [{transform_indices = @transform_0, window_bounds = array<i64: 32, 256>}, {transform_indices = @transform_1, window_bounds = array<i64: 256, 128>}, {transform_indices = @transform_2, window_bounds = array<i64: 32, 1>}, {transform_indices = @transform_3, window_bounds = array<i64: 32, 128>}]} {
    %c0_i32 = arith.constant 0 : i32
    %0 = arith.cmpi eq, %arg2, %c0_i32 : i32
    %1 = arith.extui %0 : i1 to i32
    %c0_i32_0 = arith.constant 0 : i32
    %2 = arith.cmpi ne, %1, %c0_i32_0 : i32
    scf.if %2 {
      %cst_10 = arith.constant 0.000000e+00 : f32
      %12 = vector.broadcast %cst_10 : f32 to vector<32x128xf32>
      %c0_11 = arith.constant 0 : index
      %c0_12 = arith.constant 0 : index
      %13 = vector.load %arg7[%c0_11, %c0_12] : memref<32x128xf32, #tpu.memory_space<vmem>>, vector<32x128xf32>
      tpu.vector_store %arg7[%c0_11, %c0_12], %12 {strides = array<i32>} : memref<32x128xf32, #tpu.memory_space<vmem>>, vector<32x128xf32>,
    } else {
    }
    %c0 = arith.constant 0 : index
    %c0_1 = arith.constant 0 : index
    %3 = vector.load %arg7[%c0, %c0_1] : memref<32x128xf32, #tpu.memory_space<vmem>>, vector<32x128xf32>
    %c0_2 = arith.constant 0 : index
    %c0_3 = arith.constant 0 : index
    %4 = vector.load %arg3[%c0_2, %c0_3] : memref<32x256xbf16, #tpu.memory_space<vmem>>, vector<32x256xbf16>
    %c0_4 = arith.constant 0 : index
    %c0_5 = arith.constant 0 : index
    %5 = vector.load %arg4[%c0_4, %c0_5] : memref<256x128xbf16, #tpu.memory_space<vmem>>, vector<256x128xbf16>
    %cst = arith.constant dense<0.000000e+00> : vector<32x128xf32>
    %6 = tpu.matmul %4, %5, %cst {dimension_numbers = #tpu.dot_dimension_numbers<[1], [0], [0], [1], [0, 0, 1, 1], [], []>} : vector<32x256xbf16>, vector<256x128xbf16>, vector<32x128xf32> -> vector<32x128xf32>
    %7 = arith.addf %3, %6 : vector<32x128xf32>
    %c0_6 = arith.constant 0 : index
    %c0_7 = arith.constant 0 : index
    %8 = vector.load %arg7[%c0_6, %c0_7] : memref<32x128xf32, #tpu.memory_space<vmem>>, vector<32x128xf32>
    tpu.vector_store %arg7[%c0_6, %c0_7], %7 {strides = array<i32>} : memref<32x128xf32, #tpu.memory_space<vmem>>, vector<32x128xf32>,
    %c0_i32_8 = arith.constant 0 : i32
    %9 = arith.cmpi eq, %arg2, %c0_i32_8 : i32
    %10 = arith.extui %9 : i1 to i32
    %c0_i32_9 = arith.constant 0 : i32
    %11 = arith.cmpi ne, %10, %c0_i32_9 : i32
    scf.if %11 {
      %c0_10 = arith.constant 0 : index
      %c0_11 = arith.constant 0 : index
      %12 = vector.load %arg7[%c0_10, %c0_11] : memref<32x128xf32, #tpu.memory_space<vmem>>, vector<32x128xf32>
      %c0_12 = arith.constant 0 : index
      %c0_13 = arith.constant 0 : index
      %13 = vector.load %arg5[%c0_12, %c0_13] : memref<32x1xf32, #tpu.memory_space<vmem>>, vector<32x1xf32>
      %14 = vector.broadcast %13 : vector<32x1xf32> to vector<32x128xf32>
      %15 = arith.addf %12, %14 : vector<32x128xf32>
      %cst_14 = arith.constant 0.000000e+00 : f32
      %16 = vector.broadcast %cst_14 : f32 to vector<32x128xf32>
      %17 = arith.maximumf %15, %16 : vector<32x128xf32>
      %c0_15 = arith.constant 0 : index
      %c0_16 = arith.constant 0 : index
      %18 = vector.load %arg6[%c0_15, %c0_16] : memref<32x128xf32, #tpu.memory_space<vmem>>, vector<32x128xf32>
      tpu.vector_store %arg6[%c0_15, %c0_16], %17 {strides = array<i32>} : memref<32x128xf32, #tpu.memory_space<vmem>>, vector<32x128xf32>,
    } else {
    }
    return
  }
  func.func @transform_0(%arg0: i32, %arg1: i32, %arg2: i32) -> (i32, i32) {
    %c0_i32 = arith.constant 0 : i32
    return %arg0, %arg2 : i32, i32
  }
  func.func @transform_1(%arg0: i32, %arg1: i32, %arg2: i32) -> (i32, i32) {
    %c0_i32 = arith.constant 0 : i32
    return %arg2, %arg1 : i32, i32
  }
  func.func @transform_2(%arg0: i32, %arg1: i32, %arg2: i32) -> (i32, i32) {
    %c0_i32 = arith.constant 0 : i32
    %c0_i32_0 = arith.constant 0 : i32
    return %arg0, %c0_i32 : i32, i32
  }
  func.func @transform_3(%arg0: i32, %arg1: i32, %arg2: i32) -> (i32, i32) {
    %c0_i32 = arith.constant 0 : i32
    return %arg0, %arg1 : i32, i32
  }
}

module attributes {stable_mosaic.version = 11 : i64} {
  func.func @_latent_kernel(%arg0: i32, %arg1: memref<2x512xf32, #tpu.memory_space<vmem>>, %arg2: memref<512x32xf32, #tpu.memory_space<vmem>>, %arg3: memref<1x32xf32, #tpu.memory_space<vmem>>, %arg4: memref<512x32xf32, #tpu.memory_space<vmem>>, %arg5: memref<1x32xf32, #tpu.memory_space<vmem>>, %arg6: memref<2x32xf32, #tpu.memory_space<vmem>>, %arg7: memref<32x512xf32, #tpu.memory_space<vmem>>, %arg8: memref<1x512xf32, #tpu.memory_space<vmem>>, %arg9: memref<2x32xf32, #tpu.memory_space<vmem>>, %arg10: memref<2x32xf32, #tpu.memory_space<vmem>>, %arg11: memref<2x512xf32, #tpu.memory_space<vmem>>) attributes {dimension_semantics = [#tpu.dimension_semantics<arbitrary>], iteration_bounds = array<i64: 1>, scalar_prefetch = 0 : i64, scratch_operands = 0 : i64, tpu.core_type = #tpu.core_type<tc>, window_params = [{pipeline_mode = #tpu.pipeline_mode<synchronous>, transform_indices = @transform_0, window_bounds = array<i64: 2, 512>}, {pipeline_mode = #tpu.pipeline_mode<synchronous>, transform_indices = @transform_1, window_bounds = array<i64: 512, 32>}, {pipeline_mode = #tpu.pipeline_mode<synchronous>, transform_indices = @transform_2, window_bounds = array<i64: 1, 32>}, {pipeline_mode = #tpu.pipeline_mode<synchronous>, transform_indices = @transform_3, window_bounds = array<i64: 512, 32>}, {pipeline_mode = #tpu.pipeline_mode<synchronous>, transform_indices = @transform_4, window_bounds = array<i64: 1, 32>}, {pipeline_mode = #tpu.pipeline_mode<synchronous>, transform_indices = @transform_5, window_bounds = array<i64: 2, 32>}, {pipeline_mode = #tpu.pipeline_mode<synchronous>, transform_indices = @transform_6, window_bounds = array<i64: 32, 512>}, {pipeline_mode = #tpu.pipeline_mode<synchronous>, transform_indices = @transform_7, window_bounds = array<i64: 1, 512>}, {pipeline_mode = #tpu.pipeline_mode<synchronous>, transform_indices = @transform_8, window_bounds = array<i64: 2, 32>}, {pipeline_mode = #tpu.pipeline_mode<synchronous>, transform_indices = @transform_9, window_bounds = array<i64: 2, 32>}, {pipeline_mode = #tpu.pipeline_mode<synchronous>, transform_indices = @transform_10, window_bounds = array<i64: 2, 512>}]} {
    %c0 = arith.constant 0 : index
    %c0_0 = arith.constant 0 : index
    %0 = vector.load %arg1[%c0, %c0_0] : memref<2x512xf32, #tpu.memory_space<vmem>>, vector<2x512xf32>
    %c0_1 = arith.constant 0 : index
    %c0_2 = arith.constant 0 : index
    %1 = vector.load %arg2[%c0_1, %c0_2] : memref<512x32xf32, #tpu.memory_space<vmem>>, vector<512x32xf32>
    %cst = arith.constant dense<0.000000e+00> : vector<2x32xf32>
    %2 = tpu.matmul %0, %1, %cst {dimension_numbers = #tpu.dot_dimension_numbers<[1], [0], [0], [1], [0, 0, 1, 1], [], []>} : vector<2x512xf32>, vector<512x32xf32>, vector<2x32xf32> -> vector<2x32xf32>
    %c0_3 = arith.constant 0 : index
    %c0_4 = arith.constant 0 : index
    %3 = vector.load %arg3[%c0_3, %c0_4] : memref<1x32xf32, #tpu.memory_space<vmem>>, vector<1x32xf32>
    %4 = vector.broadcast %3 : vector<1x32xf32> to vector<2x32xf32>
    %5 = arith.addf %2, %4 : vector<2x32xf32>
    %c0_5 = arith.constant 0 : index
    %c0_6 = arith.constant 0 : index
    %6 = vector.load %arg4[%c0_5, %c0_6] : memref<512x32xf32, #tpu.memory_space<vmem>>, vector<512x32xf32>
    %cst_7 = arith.constant dense<0.000000e+00> : vector<2x32xf32>
    %7 = tpu.matmul %0, %6, %cst_7 {dimension_numbers = #tpu.dot_dimension_numbers<[1], [0], [0], [1], [0, 0, 1, 1], [], []>} : vector<2x512xf32>, vector<512x32xf32>, vector<2x32xf32> -> vector<2x32xf32>
    %c0_8 = arith.constant 0 : index
    %c0_9 = arith.constant 0 : index
    %8 = vector.load %arg5[%c0_8, %c0_9] : memref<1x32xf32, #tpu.memory_space<vmem>>, vector<1x32xf32>
    %9 = vector.broadcast %8 : vector<1x32xf32> to vector<2x32xf32>
    %10 = arith.addf %7, %9 : vector<2x32xf32>
    %c0_10 = arith.constant 0 : index
    %c0_11 = arith.constant 0 : index
    %11 = vector.load %arg6[%c0_10, %c0_11] : memref<2x32xf32, #tpu.memory_space<vmem>>, vector<2x32xf32>
    %cst_12 = arith.constant 5.000000e-01 : f32
    %12 = vector.broadcast %cst_12 : f32 to vector<2x32xf32>
    %13 = arith.mulf %12, %10 : vector<2x32xf32>
    %14 = math.exp %13 : vector<2x32xf32>
    %15 = arith.mulf %11, %14 : vector<2x32xf32>
    %16 = arith.addf %5, %15 : vector<2x32xf32>
    %c0_13 = arith.constant 0 : index
    %c0_14 = arith.constant 0 : index
    %17 = vector.load %arg7[%c0_13, %c0_14] : memref<32x512xf32, #tpu.memory_space<vmem>>, vector<32x512xf32>
    %cst_15 = arith.constant dense<0.000000e+00> : vector<2x512xf32>
    %18 = tpu.matmul %16, %17, %cst_15 {dimension_numbers = #tpu.dot_dimension_numbers<[1], [0], [0], [1], [0, 0, 1, 1], [], []>} : vector<2x32xf32>, vector<32x512xf32>, vector<2x512xf32> -> vector<2x512xf32>
    %c0_16 = arith.constant 0 : index
    %c0_17 = arith.constant 0 : index
    %19 = vector.load %arg8[%c0_16, %c0_17] : memref<1x512xf32, #tpu.memory_space<vmem>>, vector<1x512xf32>
    %20 = vector.broadcast %19 : vector<1x512xf32> to vector<2x512xf32>
    %21 = arith.addf %18, %20 : vector<2x512xf32>
    %c0_18 = arith.constant 0 : index
    %c0_19 = arith.constant 0 : index
    %22 = vector.load %arg9[%c0_18, %c0_19] : memref<2x32xf32, #tpu.memory_space<vmem>>, vector<2x32xf32>
    tpu.vector_store %arg9[%c0_18, %c0_19], %5 {strides = array<i32>} : memref<2x32xf32, #tpu.memory_space<vmem>>, vector<2x32xf32>,
    %c0_20 = arith.constant 0 : index
    %c0_21 = arith.constant 0 : index
    %23 = vector.load %arg10[%c0_20, %c0_21] : memref<2x32xf32, #tpu.memory_space<vmem>>, vector<2x32xf32>
    tpu.vector_store %arg10[%c0_20, %c0_21], %10 {strides = array<i32>} : memref<2x32xf32, #tpu.memory_space<vmem>>, vector<2x32xf32>,
    %cst_22 = arith.constant 0.000000e+00 : f32
    %24 = vector.broadcast %cst_22 : f32 to vector<2x512xf32>
    %25 = arith.maximumf %21, %24 : vector<2x512xf32>
    %c0_23 = arith.constant 0 : index
    %c0_24 = arith.constant 0 : index
    %26 = vector.load %arg11[%c0_23, %c0_24] : memref<2x512xf32, #tpu.memory_space<vmem>>, vector<2x512xf32>
    tpu.vector_store %arg11[%c0_23, %c0_24], %25 {strides = array<i32>} : memref<2x512xf32, #tpu.memory_space<vmem>>, vector<2x512xf32>,
    return
  }
  func.func @transform_0(%arg0: i32) -> (i32, i32) {
    %c0_i32 = arith.constant 0 : i32
    %c0_i32_0 = arith.constant 0 : i32
    %c0_i32_1 = arith.constant 0 : i32
    return %c0_i32, %c0_i32_0 : i32, i32
  }
  func.func @transform_1(%arg0: i32) -> (i32, i32) {
    %c0_i32 = arith.constant 0 : i32
    %c0_i32_0 = arith.constant 0 : i32
    %c0_i32_1 = arith.constant 0 : i32
    return %c0_i32, %c0_i32_0 : i32, i32
  }
  func.func @transform_2(%arg0: i32) -> (i32, i32) {
    %c0_i32 = arith.constant 0 : i32
    %c0_i32_0 = arith.constant 0 : i32
    %c0_i32_1 = arith.constant 0 : i32
    return %c0_i32, %c0_i32_0 : i32, i32
  }
  func.func @transform_3(%arg0: i32) -> (i32, i32) {
    %c0_i32 = arith.constant 0 : i32
    %c0_i32_0 = arith.constant 0 : i32
    %c0_i32_1 = arith.constant 0 : i32
    return %c0_i32, %c0_i32_0 : i32, i32
  }
  func.func @transform_4(%arg0: i32) -> (i32, i32) {
    %c0_i32 = arith.constant 0 : i32
    %c0_i32_0 = arith.constant 0 : i32
    %c0_i32_1 = arith.constant 0 : i32
    return %c0_i32, %c0_i32_0 : i32, i32
  }
  func.func @transform_5(%arg0: i32) -> (i32, i32) {
    %c0_i32 = arith.constant 0 : i32
    %c0_i32_0 = arith.constant 0 : i32
    %c0_i32_1 = arith.constant 0 : i32
    return %c0_i32, %c0_i32_0 : i32, i32
  }
  func.func @transform_6(%arg0: i32) -> (i32, i32) {
    %c0_i32 = arith.constant 0 : i32
    %c0_i32_0 = arith.constant 0 : i32
    %c0_i32_1 = arith.constant 0 : i32
    return %c0_i32, %c0_i32_0 : i32, i32
  }
  func.func @transform_7(%arg0: i32) -> (i32, i32) {
    %c0_i32 = arith.constant 0 : i32
    %c0_i32_0 = arith.constant 0 : i32
    %c0_i32_1 = arith.constant 0 : i32
    return %c0_i32, %c0_i32_0 : i32, i32
  }
  func.func @transform_8(%arg0: i32) -> (i32, i32) {
    %c0_i32 = arith.constant 0 : i32
    %c0_i32_0 = arith.constant 0 : i32
    %c0_i32_1 = arith.constant 0 : i32
    return %c0_i32, %c0_i32_0 : i32, i32
  }
  func.func @transform_9(%arg0: i32) -> (i32, i32) {
    %c0_i32 = arith.constant 0 : i32
    %c0_i32_0 = arith.constant 0 : i32
    %c0_i32_1 = arith.constant 0 : i32
    return %c0_i32, %c0_i32_0 : i32, i32
  }
  func.func @transform_10(%arg0: i32) -> (i32, i32) {
    %c0_i32 = arith.constant 0 : i32
    %c0_i32_0 = arith.constant 0 : i32
    %c0_i32_1 = arith.constant 0 : i32
    return %c0_i32, %c0_i32_0 : i32, i32
  }
}

module attributes {stable_mosaic.version = 11 : i64} {
  func.func @_gemm_kernel(%arg0: i32, %arg1: i32, %arg2: i32, %arg3: memref<256x128xbf16, #tpu.memory_space<vmem>>, %arg4: memref<128x128xbf16, #tpu.memory_space<vmem>>, %arg5: memref<256x1xf32, #tpu.memory_space<vmem>>, %arg6: memref<256x128xf32, #tpu.memory_space<vmem>>, %arg7: memref<256x128xf32, #tpu.memory_space<vmem>>) attributes {dimension_semantics = [#tpu.dimension_semantics<parallel>, #tpu.dimension_semantics<parallel>, #tpu.dimension_semantics<arbitrary>], iteration_bounds = array<i64: 1, 1, 1>, scalar_prefetch = 0 : i64, scratch_operands = 1 : i64, tpu.core_type = #tpu.core_type<tc>, window_params = [{transform_indices = @transform_0, window_bounds = array<i64: 256, 128>}, {transform_indices = @transform_1, window_bounds = array<i64: 128, 128>}, {transform_indices = @transform_2, window_bounds = array<i64: 256, 1>}, {transform_indices = @transform_3, window_bounds = array<i64: 256, 128>}]} {
    %c0_i32 = arith.constant 0 : i32
    %0 = arith.cmpi eq, %arg2, %c0_i32 : i32
    %1 = arith.extui %0 : i1 to i32
    %c0_i32_0 = arith.constant 0 : i32
    %2 = arith.cmpi ne, %1, %c0_i32_0 : i32
    scf.if %2 {
      %cst_10 = arith.constant 0.000000e+00 : f32
      %12 = vector.broadcast %cst_10 : f32 to vector<256x128xf32>
      %c0_11 = arith.constant 0 : index
      %c0_12 = arith.constant 0 : index
      %13 = vector.load %arg7[%c0_11, %c0_12] : memref<256x128xf32, #tpu.memory_space<vmem>>, vector<256x128xf32>
      tpu.vector_store %arg7[%c0_11, %c0_12], %12 {strides = array<i32>} : memref<256x128xf32, #tpu.memory_space<vmem>>, vector<256x128xf32>,
    } else {
    }
    %c0 = arith.constant 0 : index
    %c0_1 = arith.constant 0 : index
    %3 = vector.load %arg7[%c0, %c0_1] : memref<256x128xf32, #tpu.memory_space<vmem>>, vector<256x128xf32>
    %c0_2 = arith.constant 0 : index
    %c0_3 = arith.constant 0 : index
    %4 = vector.load %arg3[%c0_2, %c0_3] : memref<256x128xbf16, #tpu.memory_space<vmem>>, vector<256x128xbf16>
    %c0_4 = arith.constant 0 : index
    %c0_5 = arith.constant 0 : index
    %5 = vector.load %arg4[%c0_4, %c0_5] : memref<128x128xbf16, #tpu.memory_space<vmem>>, vector<128x128xbf16>
    %cst = arith.constant dense<0.000000e+00> : vector<256x128xf32>
    %6 = tpu.matmul %4, %5, %cst {dimension_numbers = #tpu.dot_dimension_numbers<[1], [0], [0], [1], [0, 0, 1, 1], [], []>} : vector<256x128xbf16>, vector<128x128xbf16>, vector<256x128xf32> -> vector<256x128xf32>
    %7 = arith.addf %3, %6 : vector<256x128xf32>
    %c0_6 = arith.constant 0 : index
    %c0_7 = arith.constant 0 : index
    %8 = vector.load %arg7[%c0_6, %c0_7] : memref<256x128xf32, #tpu.memory_space<vmem>>, vector<256x128xf32>
    tpu.vector_store %arg7[%c0_6, %c0_7], %7 {strides = array<i32>} : memref<256x128xf32, #tpu.memory_space<vmem>>, vector<256x128xf32>,
    %c0_i32_8 = arith.constant 0 : i32
    %9 = arith.cmpi eq, %arg2, %c0_i32_8 : i32
    %10 = arith.extui %9 : i1 to i32
    %c0_i32_9 = arith.constant 0 : i32
    %11 = arith.cmpi ne, %10, %c0_i32_9 : i32
    scf.if %11 {
      %c0_10 = arith.constant 0 : index
      %c0_11 = arith.constant 0 : index
      %12 = vector.load %arg7[%c0_10, %c0_11] : memref<256x128xf32, #tpu.memory_space<vmem>>, vector<256x128xf32>
      %c0_12 = arith.constant 0 : index
      %c0_13 = arith.constant 0 : index
      %13 = vector.load %arg5[%c0_12, %c0_13] : memref<256x1xf32, #tpu.memory_space<vmem>>, vector<256x1xf32>
      %14 = vector.broadcast %13 : vector<256x1xf32> to vector<256x128xf32>
      %15 = arith.addf %12, %14 : vector<256x128xf32>
      %c0_14 = arith.constant 0 : index
      %c0_15 = arith.constant 0 : index
      %16 = vector.load %arg6[%c0_14, %c0_15] : memref<256x128xf32, #tpu.memory_space<vmem>>, vector<256x128xf32>
      tpu.vector_store %arg6[%c0_14, %c0_15], %15 {strides = array<i32>} : memref<256x128xf32, #tpu.memory_space<vmem>>, vector<256x128xf32>,
    } else {
    }
    return
  }
  func.func @transform_0(%arg0: i32, %arg1: i32, %arg2: i32) -> (i32, i32) {
    %c0_i32 = arith.constant 0 : i32
    return %arg0, %arg2 : i32, i32
  }
  func.func @transform_1(%arg0: i32, %arg1: i32, %arg2: i32) -> (i32, i32) {
    %c0_i32 = arith.constant 0 : i32
    return %arg2, %arg1 : i32, i32
  }
  func.func @transform_2(%arg0: i32, %arg1: i32, %arg2: i32) -> (i32, i32) {
    %c0_i32 = arith.constant 0 : i32
    %c0_i32_0 = arith.constant 0 : i32
    return %arg0, %c0_i32 : i32, i32
  }
  func.func @transform_3(%arg0: i32, %arg1: i32, %arg2: i32) -> (i32, i32) {
    %c0_i32 = arith.constant 0 : i32
    return %arg0, %arg1 : i32, i32
  }
}

module attributes {stable_mosaic.version = 11 : i64} {
  func.func @_gemm_kernel(%arg0: i32, %arg1: i32, %arg2: i32, %arg3: memref<64x128xbf16, #tpu.memory_space<vmem>>, %arg4: memref<128x128xbf16, #tpu.memory_space<vmem>>, %arg5: memref<64x1xf32, #tpu.memory_space<vmem>>, %arg6: memref<64x128xf32, #tpu.memory_space<vmem>>, %arg7: memref<64x128xf32, #tpu.memory_space<vmem>>) attributes {dimension_semantics = [#tpu.dimension_semantics<parallel>, #tpu.dimension_semantics<parallel>, #tpu.dimension_semantics<arbitrary>], iteration_bounds = array<i64: 1, 1, 1>, scalar_prefetch = 0 : i64, scratch_operands = 1 : i64, tpu.core_type = #tpu.core_type<tc>, window_params = [{transform_indices = @transform_0, window_bounds = array<i64: 64, 128>}, {transform_indices = @transform_1, window_bounds = array<i64: 128, 128>}, {transform_indices = @transform_2, window_bounds = array<i64: 64, 1>}, {transform_indices = @transform_3, window_bounds = array<i64: 64, 128>}]} {
    %c0_i32 = arith.constant 0 : i32
    %0 = arith.cmpi eq, %arg2, %c0_i32 : i32
    %1 = arith.extui %0 : i1 to i32
    %c0_i32_0 = arith.constant 0 : i32
    %2 = arith.cmpi ne, %1, %c0_i32_0 : i32
    scf.if %2 {
      %cst_10 = arith.constant 0.000000e+00 : f32
      %12 = vector.broadcast %cst_10 : f32 to vector<64x128xf32>
      %c0_11 = arith.constant 0 : index
      %c0_12 = arith.constant 0 : index
      %13 = vector.load %arg7[%c0_11, %c0_12] : memref<64x128xf32, #tpu.memory_space<vmem>>, vector<64x128xf32>
      tpu.vector_store %arg7[%c0_11, %c0_12], %12 {strides = array<i32>} : memref<64x128xf32, #tpu.memory_space<vmem>>, vector<64x128xf32>,
    } else {
    }
    %c0 = arith.constant 0 : index
    %c0_1 = arith.constant 0 : index
    %3 = vector.load %arg7[%c0, %c0_1] : memref<64x128xf32, #tpu.memory_space<vmem>>, vector<64x128xf32>
    %c0_2 = arith.constant 0 : index
    %c0_3 = arith.constant 0 : index
    %4 = vector.load %arg3[%c0_2, %c0_3] : memref<64x128xbf16, #tpu.memory_space<vmem>>, vector<64x128xbf16>
    %c0_4 = arith.constant 0 : index
    %c0_5 = arith.constant 0 : index
    %5 = vector.load %arg4[%c0_4, %c0_5] : memref<128x128xbf16, #tpu.memory_space<vmem>>, vector<128x128xbf16>
    %cst = arith.constant dense<0.000000e+00> : vector<64x128xf32>
    %6 = tpu.matmul %4, %5, %cst {dimension_numbers = #tpu.dot_dimension_numbers<[1], [0], [0], [1], [0, 0, 1, 1], [], []>} : vector<64x128xbf16>, vector<128x128xbf16>, vector<64x128xf32> -> vector<64x128xf32>
    %7 = arith.addf %3, %6 : vector<64x128xf32>
    %c0_6 = arith.constant 0 : index
    %c0_7 = arith.constant 0 : index
    %8 = vector.load %arg7[%c0_6, %c0_7] : memref<64x128xf32, #tpu.memory_space<vmem>>, vector<64x128xf32>
    tpu.vector_store %arg7[%c0_6, %c0_7], %7 {strides = array<i32>} : memref<64x128xf32, #tpu.memory_space<vmem>>, vector<64x128xf32>,
    %c0_i32_8 = arith.constant 0 : i32
    %9 = arith.cmpi eq, %arg2, %c0_i32_8 : i32
    %10 = arith.extui %9 : i1 to i32
    %c0_i32_9 = arith.constant 0 : i32
    %11 = arith.cmpi ne, %10, %c0_i32_9 : i32
    scf.if %11 {
      %c0_10 = arith.constant 0 : index
      %c0_11 = arith.constant 0 : index
      %12 = vector.load %arg7[%c0_10, %c0_11] : memref<64x128xf32, #tpu.memory_space<vmem>>, vector<64x128xf32>
      %c0_12 = arith.constant 0 : index
      %c0_13 = arith.constant 0 : index
      %13 = vector.load %arg5[%c0_12, %c0_13] : memref<64x1xf32, #tpu.memory_space<vmem>>, vector<64x1xf32>
      %14 = vector.broadcast %13 : vector<64x1xf32> to vector<64x128xf32>
      %15 = arith.addf %12, %14 : vector<64x128xf32>
      %c0_14 = arith.constant 0 : index
      %c0_15 = arith.constant 0 : index
      %16 = vector.load %arg6[%c0_14, %c0_15] : memref<64x128xf32, #tpu.memory_space<vmem>>, vector<64x128xf32>
      tpu.vector_store %arg6[%c0_14, %c0_15], %15 {strides = array<i32>} : memref<64x128xf32, #tpu.memory_space<vmem>>, vector<64x128xf32>,
    } else {
    }
    return
  }
  func.func @transform_0(%arg0: i32, %arg1: i32, %arg2: i32) -> (i32, i32) {
    %c0_i32 = arith.constant 0 : i32
    return %arg0, %arg2 : i32, i32
  }
  func.func @transform_1(%arg0: i32, %arg1: i32, %arg2: i32) -> (i32, i32) {
    %c0_i32 = arith.constant 0 : i32
    return %arg2, %arg1 : i32, i32
  }
  func.func @transform_2(%arg0: i32, %arg1: i32, %arg2: i32) -> (i32, i32) {
    %c0_i32 = arith.constant 0 : i32
    %c0_i32_0 = arith.constant 0 : i32
    return %arg0, %c0_i32 : i32, i32
  }
  func.func @transform_3(%arg0: i32, %arg1: i32, %arg2: i32) -> (i32, i32) {
    %c0_i32 = arith.constant 0 : i32
    return %arg0, %arg1 : i32, i32
  }
}

</mosaic_0001>

<bundles_post_ra>
// kernel: conv_vae_forward.5
= control target key start
LH: loop header
LB: loop body
LE: loop exit
PB: predicated region body
PF: predicated region fallthrough
CT: control target
= control target key end

     0   :  { %v218_v0 = vmov 0.0   ;;  %vm219_vm0 = vmmov 0   ;;  %v220_v2 = vmov 0   ;;  %s280_s1 = inlined_call_operand.vmem [shape: bf16[128,128], index: 1, kind: input, shape index: {}]   ;;  %s281_s2 = inlined_call_operand.vmem [shape: f32[16,1], index: 2, kind: input, shape index: {}]   ;;  %s282_s0 = inlined_call_operand.vmem [shape: bf16[16,128], index: 0, kind: input, shape index: {}]   ;;  %s283_s3 = inlined_call_operand.vmem [shape: f32[16,128], index: 3, kind: output, shape index: {}]  }
   0x1   :  { %185 = vmatprep.subr.bf16.mxu0 %v218_v0  ;;  %v209_v1 = vld [vmem:[%s280_s1] sm:$0xff]   ;;  %201 = vmatprep.mubr.msk.bf16.mxu0 %vm219_vm0, %v218_v0  ;;  %v210_v3 = vld [vmem:[%s280_s1 + $0x8] sm:$0xff]   ;;  %v211_v4 = vld [vmem:[%s280_s1 + $0x10] sm:$0xff]  }
   0x2   :  { %208 = vset.pattern.permute.xlu0 %v220_v2  ;;  %186 = vmatpush3.bf16.msra.mxu0 %v209_v1  ;;  %v145_v5 = vld [vmem:[%s281_s2] sm:$0xff]  ;;  %v212_v6 = vld [vmem:[%s280_s1 + $0x18] sm:$0xff]   ;;  %v146_v7 = vld [vmem:[%s281_s2 + $0x8] sm:$0xff] }
   0x3   :  { %187 = vmatprep.subr.bf16.mxu0 %v218_v0  ;;  %149 = vperm.xlu0 %208, %v145_v5   ;;  %v213_v8 = vld [vmem:[%s280_s1 + $0x20] sm:$0xff]   ;;  %v214_v9 = vld [vmem:[%s280_s1 + $0x28] sm:$0xff]   ;;  %v215_v10 = vld [vmem:[%s280_s1 + $0x30] sm:$0xff]  }
   0x4   :  { %v216_v11 = vld [vmem:[%s280_s1 + $0x38] sm:$0xff]   ;;  %v217_v12 = vld [vmem:[%s282_s0] sm:$0xff]  }
   0x6   :  { %188 = vmatpush3.bf16.msra.mxu0 %v210_v3 }
   0x7   :  { %189 = vmatprep.subr.bf16.mxu0 %v218_v0  ;;  %154 = vperm.xlu0 %208, %v146_v7  }
   0xa   :  { %190 = vmatpush3.bf16.msra.mxu0 %v211_v4 }
   0xb   :  { %191 = vmatprep.subr.bf16.mxu0 %v218_v0 }
   0xe   :  { %192 = vmatpush3.bf16.msra.mxu0 %v212_v6 }
   0xf   :  { %193 = vmatprep.subr.bf16.mxu0 %v218_v0 }
  0x12   :  { %194 = vmatpush3.bf16.msra.mxu0 %v213_v8 }
  0x13   :  { %195 = vmatprep.subr.bf16.mxu0 %v218_v0 }
  0x16   :  { %196 = vmatpush3.bf16.msra.mxu0 %v214_v9 }
  0x17   :  { %197 = vmatprep.subr.bf16.mxu0 %v218_v0 }
  0x1a   :  { %198 = vmatpush3.bf16.msra.mxu0 %v215_v10 }
  0x1b   :  { %199 = vmatprep.subr.bf16.mxu0 %v218_v0 }
  0x1e   :  { %200 = vmatpush3.bf16.msra.mxu0 %v216_v11 }
  0x21   :  { %202 = vmatmul.mubr.bf16.vlgmr.msra.gmra.mrb[0].mxu0 %v217_v12 }
  0x82   :  { %v150_v13 = vpop.permute.xlu0 %149 }
  0x86   :  { %v155_v17 = vpop.permute.xlu0 %154 }
  0xf4   :  { %v129_v14 = vpop.f32.mrb[0].mxu0 }
  0xf5   :  { %v157_v15 = vadd.f32 %v150_v13, %v129_v14  ;;  %v203_v16 = vpop.f32.mrb[1].mxu0 }
  0xf6   :  { %v132_v18 = vpop.f32.mrb[2].mxu0 }
  0xf7   :  { %v159_v19 = vmax.f32 %v157_v15, 0.0  ;;  %v158_v20 = vadd.f32 %v155_v17, %v132_v18  ;;  %v204_v21 = vpop.f32.mrb[3].mxu0 }
  0xf9   :  { %161 = vst [vmem:[%s283_s3] sm:$0xff] %v159_v19  ;;  %v160_v22 = vmax.f32 %v158_v20, 0.0 }
  0xfb   :  { %162 = vst [vmem:[%s283_s3 + $0x8] sm:$0xff] %v160_v22 }

// kernel: conv_vae_forward.6
= control target key start
LH: loop header
LB: loop body
LE: loop exit
PB: predicated region body
PF: predicated region fallthrough
CT: control target
= control target key end

     0   :  { %v372_v1 = vmov 0   ;;  %s477_s1 = inlined_call_operand.vmem [shape: bf16[256,128], index: 1, kind: input, shape index: {}]   ;;  %s478_s0 = inlined_call_operand.vmem [shape: bf16[32,256], index: 0, kind: input, shape index: {}]   ;;  %s479_s2 = inlined_call_operand.vmem [shape: f32[32,1], index: 2, kind: input, shape index: {}]   ;;  %s480_s3 = inlined_call_operand.vmem [shape: f32[32,128], index: 3, kind: output, shape index: {}]  }
   0x1   :  { %v350_v0 = vld [vmem:[%s477_s1 + $0x40] sm:$0xff]   ;;  %349 = vset.pattern.permute.xlu1 %v372_v1  ;;  %348 = vset.pattern.permute.xlu0 %v372_v1  ;;  %v352_v3 = vld [vmem:[%s477_s1 + $0x48] sm:$0xff]   ;;  %v354_v5 = vld [vmem:[%s477_s1 + $0x50] sm:$0xff]  }
   0x2   :  { %v351_v2 = vld [vmem:[%s477_s1] sm:$0xff]   ;;  %303 = vmatprep.subr.bf16.mxu0 %v350_v0  ;;  %331 = vmatprep.subr.bf16.mxu1 %v350_v0  ;;  %v353_v4 = vld [vmem:[%s477_s1 + $0x8] sm:$0xff]   ;;  %v355_v6 = vld [vmem:[%s477_s1 + $0x10] sm:$0xff]  }
   0x3   :  { %304 = vmatpush3.bf16.msra.mxu0 %v351_v2  ;;  %339 = vmatpush3.bf16.msra.mxu1 %v351_v2  ;;  %v356_v7 = vld [vmem:[%s477_s1 + $0x58] sm:$0xff]   ;;  %v358_v9 = vld [vmem:[%s477_s1 + $0x60] sm:$0xff]   ;;  %v360_v11 = vld [vmem:[%s477_s1 + $0x68] sm:$0xff]  }
   0x4   :  { %305 = vmatprep.subr.bf16.mxu0 %v352_v3  ;;  %332 = vmatprep.subr.bf16.mxu1 %v352_v3  ;;  %v357_v8 = vld [vmem:[%s477_s1 + $0x18] sm:$0xff]   ;;  %v359_v10 = vld [vmem:[%s477_s1 + $0x20] sm:$0xff]   ;;  %v361_v14 = vld [vmem:[%s477_s1 + $0x28] sm:$0xff]  }
   0x5   :  { %v368_v12 = vld [vmem:[%s478_s0 + $0x4] ss:$8 sps:$4 sm:$0xff]   ;;  %v371_v13 = vld [vmem:[%s478_s0 + $0x14] ss:$8 sps:$4 sm:$0xff]   ;;  %v366_v23 = vld [vmem:[%s478_s0] ss:$8 sps:$4 sm:$0xff]  }
   0x6   :  { %v245_v15 = vld [vmem:[%s479_s2 + $0x10] sm:$0xff]  ;;  %v243_v16 = vld [vmem:[%s479_s2] sm:$0xff]  ;;  %211 = vmatprep.mubr.bf16.mxu0 %v368_v12  ;;  %219 = vmatprep.mubr.bf16.mxu1 %v371_v13  ;;  %v246_v19 = vld [vmem:[%s479_s2 + $0x18] sm:$0xff] }
   0x7   :  { %306 = vmatpush3.bf16.msra.mxu0 %v353_v4  ;;  %340 = vmatpush3.bf16.msra.mxu1 %v353_v4  ;;  %v362_v17 = vld [vmem:[%s477_s1 + $0x70] sm:$0xff]   ;;  %v244_v20 = vld [vmem:[%s479_s2 + $0x8] sm:$0xff]  ;;  %v364_v21 = vld [vmem:[%s477_s1 + $0x78] sm:$0xff]  }
   0x8   :  { %307 = vmatprep.subr.bf16.mxu0 %v354_v5  ;;  %333 = vmatprep.subr.bf16.mxu1 %v354_v5  ;;  %v363_v18 = vld [vmem:[%s477_s1 + $0x30] sm:$0xff]   ;;  %v365_v22 = vld [vmem:[%s477_s1 + $0x38] sm:$0xff]  }
   0x9   :  { %259 = vperm.xlu1 %349, %v245_v15   ;;  %249 = vperm.xlu0 %348, %v243_v16   ;;  %v369_v24 = vld [vmem:[%s478_s0 + $0x10] ss:$8 sps:$4 sm:$0xff]  }
   0xb   :  { %308 = vmatpush3.bf16.msra.mxu0 %v355_v6  ;;  %341 = vmatpush3.bf16.msra.mxu1 %v355_v6 }
   0xc   :  { %309 = vmatprep.subr.bf16.mxu0 %v356_v7  ;;  %334 = vmatprep.subr.bf16.mxu1 %v356_v7 }
   0xd   :  { %264 = vperm.xlu1 %349, %v246_v19   ;;  %254 = vperm.xlu0 %348, %v244_v20  }
   0xf   :  { %310 = vmatpush3.bf16.msra.mxu0 %v357_v8  ;;  %342 = vmatpush3.bf16.msra.mxu1 %v357_v8 }
  0x10   :  { %311 = vmatprep.subr.bf16.mxu0 %v358_v9  ;;  %335 = vmatprep.subr.bf16.mxu1 %v358_v9 }
  0x13   :  { %312 = vmatpush3.bf16.msra.mxu0 %v359_v10  ;;  %343 = vmatpush3.bf16.msra.mxu1 %v359_v10 }
  0x14   :  { %313 = vmatprep.subr.bf16.mxu0 %v360_v11  ;;  %336 = vmatprep.subr.bf16.mxu1 %v360_v11 }
  0x17   :  { %314 = vmatpush3.bf16.msra.mxu0 %v361_v14  ;;  %344 = vmatpush3.bf16.msra.mxu1 %v361_v14 }
  0x18   :  { %315 = vmatprep.subr.bf16.mxu0 %v362_v17  ;;  %337 = vmatprep.subr.bf16.mxu1 %v362_v17 }
  0x1b   :  { %316 = vmatpush3.bf16.msra.mxu0 %v363_v18  ;;  %345 = vmatpush3.bf16.msra.mxu1 %v363_v18 }
  0x1c   :  { %317 = vmatprep.subr.bf16.mxu0 %v364_v21  ;;  %338 = vmatprep.subr.bf16.mxu1 %v364_v21 }
  0x1f   :  { %318 = vmatpush3.bf16.msra.mxu0 %v365_v22  ;;  %346 = vmatpush3.bf16.msra.mxu1 %v365_v22 }
  0x22   :  { %212 = vmatmul.mubr.bf16.vlgmr.msra.gmra.mrb[0].mxu0 %v366_v23  ;;  %220 = vmatmul.mubr.bf16.vlgmr.msra.gmra.mrb[0].mxu1 %v369_v24 }
  0x88   :  { %v260_v25 = vpop.permute.xlu1 %259  ;;  %v250_v26 = vpop.permute.xlu0 %249 }
  0x8c   :  { %v265_v41 = vpop.permute.xlu1 %264  ;;  %v255_v42 = vpop.permute.xlu0 %254 }
  0xf5   :  { %v319_v27 = vpop.f32.mrb[0].mxu0  ;;  %v325_v28 = vpop.f32.mrb[0].mxu1 }
  0xf6   :  { %v320_v29 = vpop.f32.mrb[1].mxu0  ;;  %v326_v30 = vpop.f32.mrb[1].mxu1 }
  0xf7   :  { %v321_v31 = vadd.f32 %v320_v29, %v319_v27  ;;  %v327_v32 = vadd.f32 %v326_v30, %v325_v28  ;;  %v322_v33 = vpop.f32.mrb[2].mxu0  ;;  %v328_v34 = vpop.f32.mrb[2].mxu1 }
  0xf8   :  { %v323_v35 = vpop.f32.mrb[3].mxu0  ;;  %v329_v36 = vpop.f32.mrb[3].mxu1 }
  0xf9   :  { %v267_v37 = vadd.f32 %v321_v31, %v250_v26  ;;  %v269_v38 = vadd.f32 %v327_v32, %v260_v25  ;;  %v324_v39 = vadd.f32 %v323_v35, %v322_v33  ;;  %v330_v40 = vadd.f32 %v329_v36, %v328_v34 }
  0xfb   :  { %v271_v43 = vmax.f32 %v267_v37, 0.0  ;;  %v273_v44 = vmax.f32 %v269_v38, 0.0  ;;  %v268_v45 = vadd.f32 %v324_v39, %v255_v42  ;;  %v270_v46 = vadd.f32 %v330_v40, %v265_v41 }
  0xfd   :  { %275 = vst [vmem:[%s480_s3] sm:$0xff] %v271_v43  ;;  %277 = vst [vmem:[%s480_s3 + $0x10] sm:$0xff] %v273_v44  ;;  %v272_v47 = vmax.f32 %v268_v45, 0.0  ;;  %v274_v48 = vmax.f32 %v270_v46, 0.0 }
  0xff   :  { %276 = vst [vmem:[%s480_s3 + $0x8] sm:$0xff] %v272_v47  ;;  %278 = vst [vmem:[%s480_s3 + $0x18] sm:$0xff] %v274_v48 }

// kernel: conv_vae_forward.7
= control target key start
LH: loop header
LB: loop body
LE: loop exit
PB: predicated region body
PF: predicated region fallthrough
CT: control target
= control target key end

     0   :  { %16 = vsyncpa [#allocation3], 0  ;;  %v1074_v47 = vmov 1983009808   ;;  %v111_v49 = vlaneseq  ;;  %s1636_s0 = inlined_call_operand.vmem [shape: f32[2,512], index: 0, kind: input, shape index: {}]   ;;  %s1637_s1 = inlined_call_operand.vmem [shape: f32[512,32], index: 1, kind: input, shape index: {}]   ;;  %s1638_s2 = inlined_call_operand.vmem [shape: f32[1,32], index: 2, kind: input, shape index: {}]   ;;  %s1639_s3 = inlined_call_operand.vmem [shape: f32[512,32], index: 3, kind: input, shape index: {}]   ;;  %s1640_s4 = inlined_call_operand.vmem [shape: f32[1,32], index: 4, kind: input, shape index: {}]   ;;  %s1641_s5 = inlined_call_operand.vmem [shape: f32[2,32], index: 5, kind: input, shape index: {}]   ;;  %s1642_s6 = inlined_call_operand.vmem [shape: f32[32,512], index: 6, kind: input, shape index: {}]   ;;  %s1643_s7 = inlined_call_operand.vmem [shape: f32[1,512], index: 7, kind: input, shape index: {}]   ;;  %s1644_s8 = inlined_call_operand.hbm [shape: f32[2,32], index: 8, kind: output, shape index: {0}]   ;;  %s1645_s9 = inlined_call_operand.hbm [shape: f32[2,32], index: 9, kind: output, shape index: {1}]   ;;  %s1646_s10 = inlined_call_operand.vmem [shape: f32[2,512], index: 10, kind: output, shape index: {2}]  }
   0x1   :  { %v51_v0 = vld [vmem:[%s1637_s1 + $0x80] sm:$0xff]  ;;  %v52_v1 = vld [vmem:[%s1637_s1 + $0x88] sm:$0xff]  ;;  %v53_v11 = vld [vmem:[%s1637_s1 + $0x90] sm:$0xff]  ;;  %v109_v48 = vunpack.c.l.s4 %v1074_v47 }
   0x2   :  { %v35_v2 = vld [vmem:[%s1637_s1] sm:$0xff]  ;;  %v875_v3 = vpack.c.bf16 %v52_v1, %v51_v0  ;;  %v36_v4 = vld [vmem:[%s1637_s1 + $0x8] sm:$0xff]  ;;  %v54_v13 = vld [vmem:[%s1637_s1 + $0x98] sm:$0xff]  ;;  %v1259_v0 = vshrl.u32 %v111_v49, 7 }
   0x3   :  { %v83_v5 = vld [vmem:[%s1637_s1 + $0x180] sm:$0xff]  ;;  %v84_v6 = vld [vmem:[%s1637_s1 + $0x188] sm:$0xff]  ;;  %v877_v7 = vpack.c.bf16 %v36_v4, %v35_v2  ;;  %v37_v14 = vld [vmem:[%s1637_s1 + $0x10] sm:$0xff]  ;;  %v879_v16 = vpack.c.bf16 %v54_v13, %v53_v11  ;;  %v110_v63 = vunpack.c.0.s8 %v109_v48 }
   0x4   :  { %v907_v8 = vpack.c.bf16 %v84_v6, %v83_v5  ;;  %v67_v9 = vld [vmem:[%s1637_s1 + $0x100] sm:$0xff]  ;;  %v68_v10 = vld [vmem:[%s1637_s1 + $0x108] sm:$0xff]  ;;  %876 = vmatprep.subr.bf16.mxu0 %v875_v3  ;;  %v38_v15 = vld [vmem:[%s1637_s1 + $0x18] sm:$0xff] }
   0x5   :  { %v909_v12 = vpack.c.bf16 %v68_v10, %v67_v9  ;;  %878 = vmatpush3.bf16.msra.mxu0 %v877_v7  ;;  %v881_v17 = vpack.c.bf16 %v38_v15, %v37_v14  ;;  %v85_v18 = vld [vmem:[%s1637_s1 + $0x190] sm:$0xff]  ;;  %v86_v19 = vld [vmem:[%s1637_s1 + $0x198] sm:$0xff]  ;;  %v55_v23 = vld [vmem:[%s1637_s1 + $0xa0] sm:$0xff]  ;;  %v1286_v13 = vsub.s32 %v110_v63, %v1259_v0 }
   0x6   :  { %908 = vmatprep.subr.bf16.mxu1 %v907_v8  ;;  %v69_v20 = vld [vmem:[%s1637_s1 + $0x110] sm:$0xff]  ;;  %v911_v21 = vpack.c.bf16 %v86_v19, %v85_v18  ;;  %v70_v22 = vld [vmem:[%s1637_s1 + $0x118] sm:$0xff]  ;;  %v56_v24 = vld [vmem:[%s1637_s1 + $0xa8] sm:$0xff]  ;;  %880 = vmatprep.subr.bf16.mxu0 %v879_v16 }
   0x7   :  { %910 = vmatpush3.bf16.msra.mxu1 %v909_v12  ;;  %v913_v25 = vpack.c.bf16 %v70_v22, %v69_v20  ;;  %v883_v26 = vpack.c.bf16 %v56_v24, %v55_v23  ;;  %v39_v27 = vld [vmem:[%s1637_s1 + $0x20] sm:$0xff]  ;;  %v40_v28 = vld [vmem:[%s1637_s1 + $0x28] sm:$0xff]  ;;  %v57_v35 = vld [vmem:[%s1637_s1 + $0xb0] sm:$0xff] }
   0x8   :  { %v87_v29 = vld [vmem:[%s1637_s1 + $0x1a0] sm:$0xff]  ;;  %912 = vmatprep.subr.bf16.mxu1 %v911_v21  ;;  %v88_v30 = vld [vmem:[%s1637_s1 + $0x1a8] sm:$0xff]  ;;  %v885_v33 = vpack.c.bf16 %v40_v28, %v39_v27  ;;  %v58_v36 = vld [vmem:[%s1637_s1 + $0xb8] sm:$0xff] }
   0x9   :  { %v71_v31 = vld [vmem:[%s1637_s1 + $0x120] sm:$0xff]  ;;  %v72_v32 = vld [vmem:[%s1637_s1 + $0x128] sm:$0xff]  ;;  %882 = vmatpush3.bf16.msra.mxu0 %v881_v17  ;;  %v915_v34 = vpack.c.bf16 %v88_v30, %v87_v29  ;;  %v41_v37 = vld [vmem:[%s1637_s1 + $0x30] sm:$0xff]  ;;  %v887_v39 = vpack.c.bf16 %v58_v36, %v57_v35 }
   0xa   :  { %884 = vmatprep.subr.bf16.mxu0 %v883_v26  ;;  %v917_v38 = vpack.c.bf16 %v72_v32, %v71_v31  ;;  %v42_v40 = vld [vmem:[%s1637_s1 + $0x38] sm:$0xff]  ;;  %v89_v41 = vld [vmem:[%s1637_s1 + $0x1b0] sm:$0xff]  ;;  %v59_v46 = vld [vmem:[%s1637_s1 + $0xc0] sm:$0xff] }
   0xb   :  { %914 = vmatpush3.bf16.msra.mxu1 %v913_v25  ;;  %v90_v42 = vld [vmem:[%s1637_s1 + $0x1b8] sm:$0xff]  ;;  %v73_v44 = vld [vmem:[%s1637_s1 + $0x130] sm:$0xff]  ;;  %v60_v50 = vld [vmem:[%s1637_s1 + $0xc8] sm:$0xff]  ;;  %v889_v51 = vpack.c.bf16 %v42_v40, %v41_v37 }
   0xc   :  { %916 = vmatprep.subr.bf16.mxu1 %v915_v34  ;;  %v919_v43 = vpack.c.bf16 %v90_v42, %v89_v41  ;;  %v74_v45 = vld [vmem:[%s1637_s1 + $0x138] sm:$0xff]  ;;  %v91_v52 = vld [vmem:[%s1637_s1 + $0x1c0] sm:$0xff]  ;;  %v92_v53 = vld [vmem:[%s1637_s1 + $0x1c8] sm:$0xff]  ;;  %v891_v55 = vpack.c.bf16 %v60_v50, %v59_v46 }
   0xd   :  { %886 = vmatpush3.bf16.msra.mxu0 %v885_v33  ;;  %v921_v54 = vpack.c.bf16 %v74_v45, %v73_v44  ;;  %v43_v56 = vld [vmem:[%s1637_s1 + $0x40] sm:$0xff]  ;;  %v44_v57 = vld [vmem:[%s1637_s1 + $0x48] sm:$0xff]  ;;  %v923_v59 = vpack.c.bf16 %v92_v53, %v91_v52  ;;  %v61_v61 = vld [vmem:[%s1637_s1 + $0xd0] sm:$0xff] }
   0xe   :  { %888 = vmatprep.subr.bf16.mxu0 %v887_v39  ;;  %v75_v58 = vld [vmem:[%s1637_s1 + $0x140] sm:$0xff]  ;;  %v76_v60 = vld [vmem:[%s1637_s1 + $0x148] sm:$0xff]  ;;  %v62_v62 = vld [vmem:[%s1637_s1 + $0xd8] sm:$0xff]  ;;  %v893_v3 = vpack.c.bf16 %v44_v57, %v43_v56 }
   0xf   :  { %918 = vmatpush3.bf16.msra.mxu1 %v917_v38  ;;  %v93_v1 = vld [vmem:[%s1637_s1 + $0x1d0] sm:$0xff]  ;;  %v94_v2 = vld [vmem:[%s1637_s1 + $0x1d8] sm:$0xff]  ;;  %v925_v4 = vpack.c.bf16 %v76_v60, %v75_v58  ;;  %v895_v5 = vpack.c.bf16 %v62_v62, %v61_v61  ;;  %v63_v11 = vld [vmem:[%s1637_s1 + $0xe0] sm:$0xff] }
  0x10   :  { %920 = vmatprep.subr.bf16.mxu1 %v919_v43  ;;  %v45_v6 = vld [vmem:[%s1637_s1 + $0x50] sm:$0xff]  ;;  %v46_v7 = vld [vmem:[%s1637_s1 + $0x58] sm:$0xff]  ;;  %v927_v9 = vpack.c.bf16 %v94_v2, %v93_v1  ;;  %v64_v12 = vld [vmem:[%s1637_s1 + $0xe8] sm:$0xff] }
  0x11   :  { %890 = vmatpush3.bf16.msra.mxu0 %v889_v51  ;;  %v77_v8 = vld [vmem:[%s1637_s1 + $0x150] sm:$0xff]  ;;  %v78_v10 = vld [vmem:[%s1637_s1 + $0x158] sm:$0xff]  ;;  %v95_v14 = vld [vmem:[%s1637_s1 + $0x1e0] sm:$0xff]  ;;  %v897_v16 = vpack.c.bf16 %v46_v7, %v45_v6  ;;  %v899_v19 = vpack.c.bf16 %v64_v12, %v63_v11 }
  0x12   :  { %892 = vmatprep.subr.bf16.mxu0 %v891_v55  ;;  %v96_v15 = vld [vmem:[%s1637_s1 + $0x1e8] sm:$0xff]  ;;  %v47_v17 = vld [vmem:[%s1637_s1 + $0x60] sm:$0xff]  ;;  %v929_v18 = vpack.c.bf16 %v78_v10, %v77_v8  ;;  %v65_v25 = vld [vmem:[%s1637_s1 + $0xf0] sm:$0xff] }
  0x13   :  { %922 = vmatpush3.bf16.msra.mxu1 %v921_v54  ;;  %v48_v20 = vld [vmem:[%s1637_s1 + $0x68] sm:$0xff]  ;;  %v79_v21 = vld [vmem:[%s1637_s1 + $0x160] sm:$0xff]  ;;  %v931_v23 = vpack.c.bf16 %v96_v15, %v95_v14  ;;  %v66_v26 = vld [vmem:[%s1637_s1 + $0xf8] sm:$0xff] }
  0x14   :  { %924 = vmatprep.subr.bf16.mxu1 %v923_v59  ;;  %v34_v22 = vld [vmem:[%s1636_s0] sm:$0xff]  ;;  %v80_v24 = vld [vmem:[%s1637_s1 + $0x168] sm:$0xff]  ;;  %v97_v29 = vld [vmem:[%s1637_s1 + $0x1f0] sm:$0xff]  ;;  %v901_v31 = vpack.c.bf16 %v48_v20, %v47_v17  ;;  %v903_v35 = vpack.c.bf16 %v66_v26, %v65_v25 }
  0x15   :  { %894 = vmatpush3.bf16.msra.mxu0 %v893_v3  ;;  %v1316_v27 = vrot.slane %v34_v22, %v1286_v13  ;;  %v107_v28 = vcombine.high %v34_v22, %v34_v22  ;;  %v98_v30 = vld [vmem:[%s1637_s1 + $0x1f8] sm:$0xff]  ;;  %v933_v34 = vpack.c.bf16 %v80_v24, %v79_v21  ;;  %v49_v36 = vld [vmem:[%s1637_s1 + $0x70] sm:$0xff]  ;;  %v284_v41 = vld [vmem:[%s1639_s3 + $0x80] sm:$0xff] }
  0x16   :  { %896 = vmatprep.subr.bf16.mxu0 %v895_v5  ;;  %v50_v37 = vld [vmem:[%s1637_s1 + $0x78] sm:$0xff]  ;;  %v81_v38 = vld [vmem:[%s1637_s1 + $0x170] sm:$0xff]  ;;  %v935_v39 = vpack.c.bf16 %v98_v30, %v97_v29  ;;  %v285_v42 = vld [vmem:[%s1639_s3 + $0x88] sm:$0xff] }
  0x17   :  { %926 = vmatpush3.bf16.msra.mxu1 %v925_v4  ;;  %v1326_v32 = vcombine.high %v1316_v27, %v1316_v27  ;;  %v1329_v33 = vrot.slane %v107_v28, %v1286_v13  ;;  %v82_v40 = vld [vmem:[%s1637_s1 + $0x178] sm:$0xff]  ;;  %v316_v44 = vld [vmem:[%s1639_s3 + $0x180] sm:$0xff]  ;;  %v317_v45 = vld [vmem:[%s1639_s3 + $0x188] sm:$0xff]  ;;  %v905_v46 = vpack.c.bf16 %v50_v37, %v49_v36  ;;  %v939_v48 = vpack.c.bf16 %v285_v42, %v284_v41 }
  0x18   :  { %928 = vmatprep.subr.bf16.mxu1 %v927_v9  ;;  %v937_v47 = vpack.c.bf16 %v82_v40, %v81_v38  ;;  %v268_v49 = vld [vmem:[%s1639_s3] sm:$0xff]  ;;  %v269_v50 = vld [vmem:[%s1639_s3 + $0x8] sm:$0xff]  ;;  %v971_v52 = vpack.c.bf16 %v317_v45, %v316_v44  ;;  %v286_v54 = vld [vmem:[%s1639_s3 + $0x90] sm:$0xff] }
  0x19   :  { %898 = vmatpush3.bf16.msra.mxu0 %v897_v16  ;;  %192 = vmatprep.mubr.f32.mxu0 %v1326_v32  ;;  %v123_v43 = vcombine.high %v1329_v33, %v1329_v33  ;;  %v300_v51 = vld [vmem:[%s1639_s3 + $0x100] sm:$0xff]  ;;  %v301_v53 = vld [vmem:[%s1639_s3 + $0x108] sm:$0xff]  ;;  %v287_v55 = vld [vmem:[%s1639_s3 + $0x98] sm:$0xff]  ;;  %v941_v58 = vpack.c.bf16 %v269_v50, %v268_v49 }
  0x1a   :  { %900 = vmatprep.subr.bf16.mxu0 %v899_v19  ;;  %v318_v56 = vld [vmem:[%s1639_s3 + $0x190] sm:$0xff]  ;;  %v319_v57 = vld [vmem:[%s1639_s3 + $0x198] sm:$0xff]  ;;  %v973_v59 = vpack.c.bf16 %v301_v53, %v300_v51  ;;  %v943_v60 = vpack.c.bf16 %v287_v55, %v286_v54  ;;  %v288_v3 = vld [vmem:[%s1639_s3 + $0xa0] sm:$0xff] }
  0x1b   :  { %930 = vmatpush3.bf16.msra.mxu1 %v929_v18  ;;  %262 = vmatprep.mubr.f32.mxu1 %v123_v43  ;;  %v270_v61 = vld [vmem:[%s1639_s3 + $0x10] sm:$0xff]  ;;  %v271_v62 = vld [vmem:[%s1639_s3 + $0x18] sm:$0xff]  ;;  %v975_v1 = vpack.c.bf16 %v319_v57, %v318_v56  ;;  %v289_v4 = vld [vmem:[%s1639_s3 + $0xa8] sm:$0xff] }
  0x1c   :  { %932 = vmatprep.subr.bf16.mxu1 %v931_v23  ;;  %v302_v63 = vld [vmem:[%s1639_s3 + $0x110] sm:$0xff]  ;;  %v303_v2 = vld [vmem:[%s1639_s3 + $0x118] sm:$0xff]  ;;  %v320_v5 = vld [vmem:[%s1639_s3 + $0x1a0] sm:$0xff]  ;;  %v945_v7 = vpack.c.bf16 %v271_v62, %v270_v61  ;;  %v947_v9 = vpack.c.bf16 %v289_v4, %v288_v3 }
  0x1d   :  { %902 = vmatpush3.bf16.msra.mxu0 %v901_v31  ;;  %v321_v6 = vld [vmem:[%s1639_s3 + $0x1a8] sm:$0xff]  ;;  %v977_v8 = vpack.c.bf16 %v303_v2, %v302_v63  ;;  %v272_v10 = vld [vmem:[%s1639_s3 + $0x20] sm:$0xff]  ;;  %v290_v16 = vld [vmem:[%s1639_s3 + $0xb0] sm:$0xff] }
  0x1e   :  { %904 = vmatprep.subr.bf16.mxu0 %v903_v35  ;;  %v273_v11 = vld [vmem:[%s1639_s3 + $0x28] sm:$0xff]  ;;  %v304_v12 = vld [vmem:[%s1639_s3 + $0x120] sm:$0xff]  ;;  %v979_v14 = vpack.c.bf16 %v321_v6, %v320_v5  ;;  %v291_v17 = vld [vmem:[%s1639_s3 + $0xb8] sm:$0xff] }
  0x1f   :  { %934 = vmatpush3.bf16.msra.mxu1 %v933_v34  ;;  %v305_v15 = vld [vmem:[%s1639_s3 + $0x128] sm:$0xff]  ;;  %v322_v18 = vld [vmem:[%s1639_s3 + $0x1b0] sm:$0xff]  ;;  %v323_v19 = vld [vmem:[%s1639_s3 + $0x1b8] sm:$0xff]  ;;  %v949_v20 = vpack.c.bf16 %v273_v11, %v272_v10  ;;  %v951_v22 = vpack.c.bf16 %v291_v17, %v290_v16 }
  0x20   :  { %936 = vmatprep.subr.bf16.mxu1 %v935_v39  ;;  %v981_v21 = vpack.c.bf16 %v305_v15, %v304_v12  ;;  %v274_v23 = vld [vmem:[%s1639_s3 + $0x30] sm:$0xff]  ;;  %v275_v24 = vld [vmem:[%s1639_s3 + $0x38] sm:$0xff]  ;;  %v983_v26 = vpack.c.bf16 %v323_v19, %v322_v18  ;;  %v292_v29 = vld [vmem:[%s1639_s3 + $0xc0] sm:$0xff] }
  0x21   :  { %906 = vmatpush3.bf16.msra.mxu0 %v905_v46  ;;  %v306_v25 = vld [vmem:[%s1639_s3 + $0x130] sm:$0xff]  ;;  %v307_v28 = vld [vmem:[%s1639_s3 + $0x138] sm:$0xff]  ;;  %v293_v30 = vld [vmem:[%s1639_s3 + $0xc8] sm:$0xff] }
  0x22   :  { %940 = vmatprep.subr.bf16.mxu0 %v939_v48  ;;  %v324_v31 = vld [vmem:[%s1639_s3 + $0x1c0] sm:$0xff] }
  0x23   :  { %938 = vmatpush3.bf16.msra.mxu1 %v937_v47 }
  0x24   :  { %972 = vmatprep.subr.bf16.mxu1 %v971_v52  ;;  %193 = vmatmul.mubr.f32.vlgmr.msra.gmra.mrb[0].mxu0 %v1316_v27 }
  0x25   :  { %942 = vmatpush3.bf16.msra.mxu0 %v941_v58  ;;  %403 = vmatprep.mubr.f32.mxu0 %v1326_v32  ;;  %v325_v32 = vld [vmem:[%s1639_s3 + $0x1c8] sm:$0xff] }
  0x26   :  { %263 = vmatmul.mubr.f32.vlgmr.msra.gmra.mrb[0].mxu1 %v1329_v33  ;;  %944 = vmatprep.subr.bf16.mxu0 %v943_v60 }
  0x27   :  { %974 = vmatpush3.bf16.msra.mxu1 %v973_v59  ;;  %473 = vmatprep.mubr.f32.mxu1 %v123_v43 }
  0x28   :  { %976 = vmatprep.subr.bf16.mxu1 %v975_v1 }
  0x29   :  { %946 = vmatpush3.bf16.msra.mxu0 %v945_v7 }
  0x2a   :  { %948 = vmatprep.subr.bf16.mxu0 %v947_v9 }
  0x2b   :  { %978 = vmatpush3.bf16.msra.mxu1 %v977_v8 }
  0x2c   :  { %980 = vmatprep.subr.bf16.mxu1 %v979_v14 }
  0x2d   :  { %17 = vsyncpa [#allocation5], 0  ;;  %950 = vmatpush3.bf16.msra.mxu0 %v949_v20  ;;  %v953_v34 = vpack.c.bf16 %v275_v24, %v274_v23  ;;  %v985_v35 = vpack.c.bf16 %v307_v28, %v306_v25  ;;  %v955_v36 = vpack.c.bf16 %v293_v30, %v292_v29  ;;  %v276_v37 = vld [vmem:[%s1639_s3 + $0x40] sm:$0xff]  ;;  %v277_v38 = vld [vmem:[%s1639_s3 + $0x48] sm:$0xff]  ;;  %v987_v40 = vpack.c.bf16 %v325_v32, %v324_v31  ;;  %s1077_s30 = smov [#allocation4]  }
  0x2e   :  { %952 = vmatprep.subr.bf16.mxu0 %v951_v22  ;;  %v308_v39 = vld [vmem:[%s1639_s3 + $0x140] sm:$0xff]  ;;  %v309_v41 = vld [vmem:[%s1639_s3 + $0x148] sm:$0xff]  ;;  %v294_v42 = vld [vmem:[%s1639_s3 + $0xd0] sm:$0xff]  ;;  %v957_v46 = vpack.c.bf16 %v277_v38, %v276_v37  ;;  %v1075_v23 = vmov 0.0   ;;  %vm669_vm0 = vcmask 254976   ;;  %vm523_vm1 = vcmask 261120  }
  0x2f   :  { %982 = vmatpush3.bf16.msra.mxu1 %v981_v21  ;;  %v295_v43 = vld [vmem:[%s1639_s3 + $0xd8] sm:$0xff]  ;;  %v326_v44 = vld [vmem:[%s1639_s3 + $0x1d0] sm:$0xff]  ;;  %v989_v47 = vpack.c.bf16 %v309_v41, %v308_v39  ;;  %v296_v54 = vld [vmem:[%s1639_s3 + $0xe0] sm:$0xff]  ;;  %s715_s11 = sshll.u32 %s1077_s30, 4  ;;  %s716_s11 = int_to_ptr.vmem [resolvable:$true] %s715_s11 }
  0x30   :  { %984 = vmatprep.subr.bf16.mxu1 %v983_v26  ;;  %v327_v45 = vld [vmem:[%s1639_s3 + $0x1d8] sm:$0xff]  ;;  %v959_v48 = vpack.c.bf16 %v295_v43, %v294_v42  ;;  %v278_v49 = vld [vmem:[%s1639_s3 + $0x50] sm:$0xff]  ;;  %v297_v55 = vld [vmem:[%s1639_s3 + $0xe8] sm:$0xff] }
  0x31   :  { %954 = vmatpush3.bf16.msra.mxu0 %v953_v34  ;;  %v279_v50 = vld [vmem:[%s1639_s3 + $0x58] sm:$0xff]  ;;  %v310_v51 = vld [vmem:[%s1639_s3 + $0x150] sm:$0xff]  ;;  %v991_v52 = vpack.c.bf16 %v327_v45, %v326_v44  ;;  %v328_v56 = vld [vmem:[%s1639_s3 + $0x1e0] sm:$0xff]  ;;  %v963_v60 = vpack.c.bf16 %v297_v55, %v296_v54 }
  0x32   :  { %956 = vmatprep.subr.bf16.mxu0 %v955_v36  ;;  %v311_v53 = vld [vmem:[%s1639_s3 + $0x158] sm:$0xff]  ;;  %v329_v57 = vld [vmem:[%s1639_s3 + $0x1e8] sm:$0xff]  ;;  %v961_v58 = vpack.c.bf16 %v279_v50, %v278_v49  ;;  %v280_v61 = vld [vmem:[%s1639_s3 + $0x60] sm:$0xff] }
  0x33   :  { %986 = vmatpush3.bf16.msra.mxu1 %v985_v35  ;;  %v993_v59 = vpack.c.bf16 %v311_v53, %v310_v51  ;;  %v281_v62 = vld [vmem:[%s1639_s3 + $0x68] sm:$0xff]  ;;  %v312_v63 = vld [vmem:[%s1639_s3 + $0x160] sm:$0xff]  ;;  %v995_v1 = vpack.c.bf16 %v329_v57, %v328_v56  ;;  %v298_v3 = vld [vmem:[%s1639_s3 + $0xf0] sm:$0xff] }
  0x34   :  { %988 = vmatprep.subr.bf16.mxu1 %v987_v40  ;;  %v313_v2 = vld [vmem:[%s1639_s3 + $0x168] sm:$0xff]  ;;  %v299_v4 = vld [vmem:[%s1639_s3 + $0xf8] sm:$0xff]  ;;  %v330_v5 = vld [vmem:[%s1639_s3 + $0x1f0] sm:$0xff]  ;;  %v965_v7 = vpack.c.bf16 %v281_v62, %v280_v61 }
  0x35   :  { %958 = vmatpush3.bf16.msra.mxu0 %v957_v46  ;;  %v331_v6 = vld [vmem:[%s1639_s3 + $0x1f8] sm:$0xff]  ;;  %v997_v8 = vpack.c.bf16 %v313_v2, %v312_v63  ;;  %v967_v9 = vpack.c.bf16 %v299_v4, %v298_v3  ;;  %v282_v10 = vld [vmem:[%s1639_s3 + $0x70] sm:$0xff]  ;;  %v486_v18 = vld [vmem:[%s1642_s6 + $0x8] sm:$0xff] }
  0x36   :  { %960 = vmatprep.subr.bf16.mxu0 %v959_v48  ;;  %v283_v11 = vld [vmem:[%s1639_s3 + $0x78] sm:$0xff]  ;;  %v999_v12 = vpack.c.bf16 %v331_v6, %v330_v5  ;;  %v314_v14 = vld [vmem:[%s1639_s3 + $0x170] sm:$0xff]  ;;  %v490_v19 = vld [vmem:[%s1642_s6 + $0x28] sm:$0xff] }
  0x37   :  { %990 = vmatpush3.bf16.msra.mxu1 %v989_v47  ;;  %v315_v15 = vld [vmem:[%s1639_s3 + $0x178] sm:$0xff]  ;;  %v969_v16 = vpack.c.bf16 %v283_v11, %v282_v10  ;;  %v1003_v21 = vpack.c.bf16 %v490_v19, %v486_v18  ;;  %v487_v26 = vld [vmem:[%s1642_s6 + $0x10] sm:$0xff]  ;;  %v494_v29 = vld [vmem:[%s1642_s6 + $0x48] sm:$0xff] }
  0x38   :  { %992 = vmatprep.subr.bf16.mxu1 %v991_v52  ;;  %v1001_v17 = vpack.c.bf16 %v315_v15, %v314_v14  ;;  %v488_v20 = vld [vmem:[%s1642_s6 + $0x18] sm:$0xff]  ;;  %v491_v28 = vld [vmem:[%s1642_s6 + $0x30] sm:$0xff]  ;;  %v498_v31 = vld [vmem:[%s1642_s6 + $0x68] sm:$0xff] }
  0x39   :  { %962 = vmatpush3.bf16.msra.mxu0 %v961_v58  ;;  %v492_v22 = vld [vmem:[%s1642_s6 + $0x38] sm:$0xff]  ;;  %v1013_v30 = vpack.c.bf16 %v491_v28, %v487_v26  ;;  %v1007_v35 = vpack.c.bf16 %v498_v31, %v494_v29  ;;  %v493_v37 = vld [vmem:[%s1642_s6 + $0x40] sm:$0xff]  ;;  %v495_v39 = vld [vmem:[%s1642_s6 + $0x50] sm:$0xff] }
  0x3a   :  { %964 = vmatprep.subr.bf16.mxu0 %v963_v60  ;;  %v1011_v24 = vpack.c.bf16 %v492_v22, %v488_v20  ;;  %v496_v32 = vld [vmem:[%s1642_s6 + $0x58] sm:$0xff]  ;;  %v497_v38 = vld [vmem:[%s1642_s6 + $0x60] sm:$0xff]  ;;  %v499_v41 = vld [vmem:[%s1642_s6 + $0x70] sm:$0xff] }
  0x3b   :  { %994 = vmatpush3.bf16.msra.mxu1 %v993_v59  ;;  %v500_v34 = vld [vmem:[%s1642_s6 + $0x78] sm:$0xff]  ;;  %v1009_v40 = vpack.c.bf16 %v497_v38, %v493_v37  ;;  %v1017_v42 = vpack.c.bf16 %v499_v41, %v495_v39  ;;  %v731_v44 = vld [vmem:[%s1638_s2] ss:$0 sm:$0xff] }
  0x3c   :  { %996 = vmatprep.subr.bf16.mxu1 %v995_v1  ;;  %v1015_v36 = vpack.c.bf16 %v500_v34, %v496_v32  ;;  %v732_v53 = vld [vmem:[%s1640_s4] ss:$0 sm:$0xff]  ;;  %s1076_s4 = smov [#allocation2]  }
  0x3d   :  { %966 = vmatpush3.bf16.msra.mxu0 %v965_v7  ;;  %v479_v63 = vld [vmem:[%s1641_s5] sm:$0x3]  ;;  %s705_s1 = sshll.u32 %s1076_s4, 4  ;;  %s706_s1 = int_to_ptr.vmem [resolvable:$true] %s705_s1 }
  0x3e   :  { %968 = vmatprep.subr.bf16.mxu0 %v967_v9  ;;  %s1026_s0 = scalar_lea.vmem %s706_s1, 32  ;;  %p1031_p1 = scmp.lt.s32.totalorder %s706_s1, %s706_s1 }
  0x3f   :  { %998 = vmatpush3.bf16.msra.mxu1 %v997_v8  ;;  %p1027_p0 = scmp.ne.s32.totalorder %s706_s1, %s1026_s0  ;;  %p1032_p2 = scmp.lt.s32.totalorder %s1026_s0, %s1026_s0 }
  0x40   :  { %1000 = vmatprep.subr.bf16.mxu1 %v999_v12 }
  0x41   :  { %970 = vmatpush3.bf16.msra.mxu0 %v969_v16  ;;  %p1033_p3 = por %p1032_p2, %p1031_p1 }
  0x42   :  { %1004 = vmatprep.subr.bf16.mxu0 %v1003_v21 }
  0x43   :  { %1002 = vmatpush3.bf16.msra.mxu1 %v1001_v17  ;;  %p1034_p4 = pnand %p1033_p3, %p1027_p0 }
  0x44   :  { %404 = vmatmul.mubr.f32.vlgmr.msra.gmra.mrb[2].mxu0 %v1316_v27  ;;  %v485_v27 = vld [vmem:[%s1642_s6] sm:$0xff]  ;;  %1012 = vmatprep.subr.bf16.mxu1 %v1011_v24 }
  0x45   :  { %591 = vmatprep.mubr.f32.mxu0 %v1075_v23 }
  0x46   :  { %474 = vmatmul.mubr.f32.vlgmr.msra.gmra.mrb[2].mxu1 %v1329_v33  ;;  %v489_v33 = vld [vmem:[%s1642_s6 + $0x20] sm:$0xff] }
  0x47   :  { %662 = vmatprep.mubr.f32.mxu1 %v1075_v23  ;;  %v1005_v25 = vpack.c.bf16 %v489_v33, %v485_v27  ;;  %1014 = vmatpush1.bf16.msra.mxu1 %v1013_v30 }
  0x48   :  { %1016 = vmatprep.subr.bf16.mxu1 %v1015_v36 }
  0x49   :  { %1006 = vmatpush1.bf16.msra.mxu0 %v1005_v25 }
  0x4a   :  { %1008 = vmatprep.subr.bf16.mxu0 %v1007_v35 }
  0x4b   :  { %1018 = vmatpush1.bf16.msra.mxu1 %v1017_v42 }
  0x4d   :  { %1010 = vmatpush1.bf16.msra.mxu0 %v1009_v40 }
  0xf7   :  { %v767_v43 = vpop.f32.mrb[0].mxu0 }
  0xf8   :  { %v768_v45 = vpop.f32.mrb[1].mxu0 }
  0xf9   :  { %v802_v46 = vpop.f32.mrb[0].mxu1  ;;  %v769_v47 = vadd.f32 %v768_v45, %v767_v43 }
  0xfa   :  { %v803_v48 = vpop.f32.mrb[1].mxu1 }
  0xfb   :  { %v804_v49 = vadd.f32 %v803_v48, %v802_v46  ;;  %v195_v50 = vadd.f32 %v769_v47, %v731_v44 }
  0xfd   :  { %v265_v51 = vadd.f32 %v804_v49, %v195_v50 }
  0xff   :  { %670 = vst.msk [vmem:[#allocation2] sm:$0x3] %vm669_vm0, %v265_v51 }
 0x117   :  { %v837_v52 = vpop.f32.mrb[2].mxu0 }
 0x118   :  { %v838_v54 = vpop.f32.mrb[3].mxu0 }
 0x119   :  { %v872_v55 = vpop.f32.mrb[2].mxu1  ;;  %v839_v56 = vadd.f32 %v838_v54, %v837_v52 }
 0x11a   :  { %v873_v57 = vpop.f32.mrb[3].mxu1 }
 0x11b   :  { %v874_v58 = vadd.f32 %v873_v57, %v872_v55  ;;  %v406_v59 = vadd.f32 %v839_v56, %v732_v53 }
 0x11d   :  { %v476_v60 = vadd.f32 %v874_v58, %v406_v59 }
 0x11f   :  { %v480_v61 = vmul.f32 0.5, %v476_v60  ;;  %671 = vst.msk [vmem:[#allocation4] sm:$0x3] %vm669_vm0, %v476_v60 }
 0x121   :  { %v481_v62 = vmul.f32 1.442695, %v480_v61 }
 0x123   :  { %1024 = vpow2.f32 %v481_v62 }
 0x12d   :  { %v1025_v1 = vpop.eup %1024 }
 0x12e   :  { %v483_v2 = vmul.f32 %v1025_v1, %v479_v63 }
 0x130   :  { %v484_v3 = vadd.f32 %v483_v2, %v265_v51 }
 0x132   :  { %733 = vmatmul.mubr.msk.f32.vlgmr.msra.gmra.mrb[4].mxu0 %vm523_vm1, %v484_v3  ;;  %734 = vmatmul.mubr.msk.f32.vlgmr.msra.gmra.mrb[4].mxu1 %vm523_vm1, %v484_v3 }
 0x133   :  { %1037 = shalt.err (!%p1034_p4)
}
 0x134   :  { %s1038_s13 = scalar_lea.hbm %s1644_s8, 32 }
 0x135   :  { %p1039_p5 = scmp.ne.s32.totalorder %s1644_s8, %s1038_s13  ;;  %p1042_p6 = scmp.lt.u32.totalorder %s1038_s13, %s1644_s8 }
 0x137   :  { %p1044_p7 = pnand %p1042_p6, %p1039_p5 }
 0x139   :  { %1047 = shalt.err (!%p1044_p7)
}
 0x13a   :  { %708 = dma.vmem_to_hbm [thread:$0]  %s706_s1, 32, %s1644_s8, [#allocation3]  }
 0x13b   :  { %s1048_s20 = scalar_lea.vmem %s716_s11, 32  ;;  %p1053_p9 = scmp.lt.s32.totalorder %s716_s11, %s716_s11 }
 0x13c   :  { %p1049_p8 = scmp.ne.s32.totalorder %s716_s11, %s1048_s20  ;;  %p1054_p10 = scmp.lt.s32.totalorder %s1048_s20, %s1048_s20 }
 0x13e   :  { %p1055_p11 = por %p1054_p10, %p1053_p9 }
 0x140   :  { %p1056_p12 = pnand %p1055_p11, %p1049_p8 }
 0x142   :  { %1059 = shalt.err (!%p1056_p12)
}
 0x143   :  { %s1060_s22 = scalar_lea.hbm %s1645_s9, 32 }
 0x144   :  { %p1061_p13 = scmp.ne.s32.totalorder %s1645_s9, %s1060_s22  ;;  %p1064_p0 = scmp.lt.u32.totalorder %s1060_s22, %s1645_s9 }
 0x146   :  { %p1066_p1 = pnand %p1064_p0, %p1061_p13 }
 0x148   :  { %1069 = shalt.err (!%p1066_p1)
}
 0x149   :  { %718 = dma.vmem_to_hbm [thread:$0]  %s716_s11, 32, %s1645_s9, [#allocation5]   ;;  %v505_v4 = vsub.s32 0, %v1259_v0  ;;  %v513_v5 = vsub.s32 2, %v1259_v0  ;;  %v501_v6 = vld [vmem:[%s1643_s7] sm:$0xf] }
 0x14a   :  { %v509_v7 = vsub.s32 1, %v1259_v0  ;;  %v517_v8 = vsub.s32 3, %v1259_v0 }
 0x14b   :  { %v506_v9 = vrot.slane %v501_v6, %v505_v4  ;;  %v514_v10 = vrot.slane %v501_v6, %v513_v5 }
 0x14c   :  { %v510_v11 = vrot.slane %v501_v6, %v509_v7  ;;  %v518_v12 = vrot.slane %v501_v6, %v517_v8 }
 0x205   :  { %v593_v14 = vpop.f32.mrb[4].mxu0  ;;  %v664_v15 = vpop.f32.mrb[4].mxu1 }
 0x206   :  { %v594_v16 = vadd.f32 %v593_v14, %v506_v9  ;;  %v665_v17 = vadd.f32 %v664_v15, %v514_v10  ;;  %v595_v18 = vpop.f32.mrb[5].mxu0  ;;  %v666_v19 = vpop.f32.mrb[5].mxu1 }
 0x207   :  { %v596_v20 = vadd.f32 %v595_v18, %v510_v11  ;;  %v667_v21 = vadd.f32 %v666_v19, %v518_v12 }
 0x208   :  { %v672_v22 = vmax.f32 %v594_v16, 0.0  ;;  %v674_v27 = vmax.f32 %v665_v17, 0.0 }
 0x209   :  { %v673_v33 = vmax.f32 %v596_v20, 0.0  ;;  %v675_v23 = vmax.f32 %v667_v21, 0.0 }
 0x20b   :  { %v680_v24 = vcombine.low %v672_v22, %v673_v33  ;;  %v681_v25 = vcombine.low %v674_v27, %v675_v23 }
 0x20d   :  { %v688_v0 = vrot.slane %v680_v24, %v1286_v13  ;;  %v695_v26 = vrot.slane %v681_v25, %v1286_v13 }
 0x20f   :  { %v696_v28 = vcombine.low %v688_v0, %v695_v26 }
 0x211   :  { %698 = vst [vmem:[%s1646_s10] sm:$0xff] %v696_v28 }
 0x212   :  { %1070 = dma.done.wait [#allocation3], 32  }
 0x213   :  { %1071 = vsyncadd [#allocation3], 4294967264 }
 0x214   :  { %1072 = dma.done.wait [#allocation5], 32  }
 0x215   :  { %1073 = vsyncadd [#allocation5], 4294967264 }
 0x216   :  { %729 = vsyncpa [#allocation3], 1 }
 0x217   :  { %730 = vsyncpa [#allocation5], 1 }

// kernel: conv_vae_forward.8
= control target key start
LH: loop header
LB: loop body
LE: loop exit
PB: predicated region body
PF: predicated region fallthrough
CT: control target
= control target key end

     0   :  { %v934_v1 = vmov 0   ;;  %s1249_s1 = inlined_call_operand.vmem [shape: bf16[128,128], index: 1, kind: input, shape index: {}]   ;;  %s1250_s2 = inlined_call_operand.vmem [shape: f32[256,1], index: 2, kind: input, shape index: {}]   ;;  %s1251_s0 = inlined_call_operand.vmem [shape: bf16[256,128], index: 0, kind: input, shape index: {}]   ;;  %s1252_s3 = inlined_call_operand.vmem [shape: f32[256,128], index: 3, kind: output, shape index: {}]  }
   0x1   :  { %v910_v0 = vld [vmem:[%s1249_s1] sm:$0xff]   ;;  %909 = vset.pattern.permute.xlu1 %v934_v1  ;;  %908 = vset.pattern.permute.xlu0 %v934_v1  ;;  %v911_v2 = vld [vmem:[%s1249_s1 + $0x8] sm:$0xff]   ;;  %v912_v3 = vld [vmem:[%s1249_s1 + $0x10] sm:$0xff]  }
   0x2   :  { %843 = vmatprep.subr.bf16.mxu0 %v910_v0  ;;  %891 = vmatprep.subr.bf16.mxu1 %v910_v0  ;;  %v537_v4 = vld [vmem:[%s1250_s2 + $0x10] sm:$0xff]  ;;  %v535_v5 = vld [vmem:[%s1250_s2] sm:$0xff]  ;;  %v913_v6 = vld [vmem:[%s1249_s1 + $0x18] sm:$0xff]  }
   0x3   :  { %844 = vmatpush3.bf16.msra.mxu0 %v910_v0  ;;  %899 = vmatpush3.bf16.msra.mxu1 %v910_v0  ;;  %v538_v7 = vld [vmem:[%s1250_s2 + $0x18] sm:$0xff]  ;;  %v536_v8 = vld [vmem:[%s1250_s2 + $0x8] sm:$0xff]  ;;  %v918_v9 = vld [vmem:[%s1251_s0] sm:$0xff]  }
   0x4   :  { %845 = vmatprep.subr.bf16.mxu0 %v911_v2  ;;  %892 = vmatprep.subr.bf16.mxu1 %v911_v2  ;;  %v919_v10 = vld [vmem:[%s1251_s0 + $0x40] sm:$0xff]   ;;  %v540_v12 = vld [vmem:[%s1250_s2 + $0x28] sm:$0xff]  ;;  %v542_v15 = vld [vmem:[%s1250_s2 + $0x38] sm:$0xff] }
   0x5   :  { %579 = vperm.xlu1 %909, %v537_v4   ;;  %569 = vperm.xlu0 %908, %v535_v5   ;;  %v914_v11 = vld [vmem:[%s1249_s1 + $0x20] sm:$0xff]   ;;  %v915_v14 = vld [vmem:[%s1249_s1 + $0x28] sm:$0xff]   ;;  %v541_v16 = vld [vmem:[%s1250_s2 + $0x30] sm:$0xff] }
   0x6   :  { %v539_v13 = vld [vmem:[%s1250_s2 + $0x20] sm:$0xff]  ;;  %859 = vmatprep.mubr.bf16.mxu0 %v918_v9  ;;  %875 = vmatprep.mubr.bf16.mxu1 %v919_v10  ;;  %v916_v17 = vld [vmem:[%s1249_s1 + $0x30] sm:$0xff]   ;;  %v544_v18 = vld [vmem:[%s1250_s2 + $0x48] sm:$0xff] }
   0x7   :  { %846 = vmatpush3.bf16.msra.mxu0 %v911_v2  ;;  %900 = vmatpush3.bf16.msra.mxu1 %v911_v2  ;;  %v543_v19 = vld [vmem:[%s1250_s2 + $0x40] sm:$0xff]  ;;  %v917_v20 = vld [vmem:[%s1249_s1 + $0x38] sm:$0xff]   ;;  %v545_v22 = vld [vmem:[%s1250_s2 + $0x50] sm:$0xff] }
   0x8   :  { %847 = vmatprep.subr.bf16.mxu0 %v912_v3  ;;  %893 = vmatprep.subr.bf16.mxu1 %v912_v3  ;;  %v546_v21 = vld [vmem:[%s1250_s2 + $0x58] sm:$0xff]  ;;  %v920_v23 = vld [vmem:[%s1251_s0 + $0x8] sm:$0xff]   ;;  %v547_v26 = vld [vmem:[%s1250_s2 + $0x60] sm:$0xff] }
   0x9   :  { %584 = vperm.xlu1 %909, %v538_v7   ;;  %574 = vperm.xlu0 %908, %v536_v8   ;;  %v921_v24 = vld [vmem:[%s1251_s0 + $0x48] sm:$0xff]   ;;  %v922_v27 = vld [vmem:[%s1251_s0 + $0x10] sm:$0xff]   ;;  %v550_v29 = vld [vmem:[%s1250_s2 + $0x78] sm:$0xff] }
   0xa   :  { %v548_v25 = vld [vmem:[%s1250_s2 + $0x68] sm:$0xff]  ;;  %v923_v28 = vld [vmem:[%s1251_s0 + $0x50] sm:$0xff]   ;;  %v924_v31 = vld [vmem:[%s1251_s0 + $0x18] sm:$0xff]  }
   0xb   :  { %848 = vmatpush3.bf16.msra.mxu0 %v912_v3  ;;  %901 = vmatpush3.bf16.msra.mxu1 %v912_v3  ;;  %v549_v30 = vld [vmem:[%s1250_s2 + $0x70] sm:$0xff]  ;;  %v925_v32 = vld [vmem:[%s1251_s0 + $0x58] sm:$0xff]   ;;  %v552_v33 = vld [vmem:[%s1250_s2 + $0x88] sm:$0xff] }
   0xc   :  { %849 = vmatprep.subr.bf16.mxu0 %v913_v6  ;;  %894 = vmatprep.subr.bf16.mxu1 %v913_v6  ;;  %v551_v34 = vld [vmem:[%s1250_s2 + $0x80] sm:$0xff]  ;;  %v554_v37 = vld [vmem:[%s1250_s2 + $0x98] sm:$0xff]  ;;  %v553_v38 = vld [vmem:[%s1250_s2 + $0x90] sm:$0xff] }
   0xd   :  { %594 = vperm.xlu1 %909, %v540_v12   ;;  %589 = vperm.xlu0 %908, %v539_v13   ;;  %v926_v35 = vld [vmem:[%s1251_s0 + $0x20] sm:$0xff]   ;;  %v928_v39 = vld [vmem:[%s1251_s0 + $0x28] sm:$0xff]   ;;  %v930_v43 = vld [vmem:[%s1251_s0 + $0x30] sm:$0xff]  }
   0xe   :  { %v927_v36 = vld [vmem:[%s1251_s0 + $0x60] sm:$0xff]   ;;  %v929_v40 = vld [vmem:[%s1251_s0 + $0x68] sm:$0xff]   ;;  %v931_v44 = vld [vmem:[%s1251_s0 + $0x70] sm:$0xff]  }
   0xf   :  { %850 = vmatpush3.bf16.msra.mxu0 %v913_v6  ;;  %902 = vmatpush3.bf16.msra.mxu1 %v913_v6  ;;  %v556_v41 = vld [vmem:[%s1250_s2 + $0xa8] sm:$0xff]  ;;  %v555_v42 = vld [vmem:[%s1250_s2 + $0xa0] sm:$0xff]  ;;  %v558_v45 = vld [vmem:[%s1250_s2 + $0xb8] sm:$0xff] }
  0x10   :  { %851 = vmatprep.subr.bf16.mxu0 %v914_v11  ;;  %895 = vmatprep.subr.bf16.mxu1 %v914_v11  ;;  %v557_v46 = vld [vmem:[%s1250_s2 + $0xb0] sm:$0xff]  ;;  %v932_v47 = vld [vmem:[%s1251_s0 + $0x38] sm:$0xff]   ;;  %v560_v49 = vld [vmem:[%s1250_s2 + $0xc8] sm:$0xff] }
  0x11   :  { %604 = vperm.xlu1 %909, %v542_v15   ;;  %599 = vperm.xlu0 %908, %v541_v16   ;;  %v933_v48 = vld [vmem:[%s1251_s0 + $0x78] sm:$0xff]   ;;  %v559_v50 = vld [vmem:[%s1250_s2 + $0xc0] sm:$0xff]  ;;  %v561_v52 = vld [vmem:[%s1250_s2 + $0xd0] sm:$0xff] }
  0x12   :  { %v562_v51 = vld [vmem:[%s1250_s2 + $0xd8] sm:$0xff]  ;;  %v564_v53 = vld [vmem:[%s1250_s2 + $0xe8] sm:$0xff]  ;;  %v563_v54 = vld [vmem:[%s1250_s2 + $0xe0] sm:$0xff] }
  0x13   :  { %852 = vmatpush3.bf16.msra.mxu0 %v914_v11  ;;  %903 = vmatpush3.bf16.msra.mxu1 %v914_v11  ;;  %v566_v55 = vld [vmem:[%s1250_s2 + $0xf8] sm:$0xff]  ;;  %v565_v56 = vld [vmem:[%s1250_s2 + $0xf0] sm:$0xff] }
  0x14   :  { %853 = vmatprep.subr.bf16.mxu0 %v915_v14  ;;  %896 = vmatprep.subr.bf16.mxu1 %v915_v14 }
  0x15   :  { %614 = vperm.xlu1 %909, %v544_v18   ;;  %609 = vperm.xlu0 %908, %v543_v19  }
  0x17   :  { %854 = vmatpush3.bf16.msra.mxu0 %v915_v14  ;;  %904 = vmatpush3.bf16.msra.mxu1 %v915_v14 }
  0x18   :  { %855 = vmatprep.subr.bf16.mxu0 %v916_v17  ;;  %897 = vmatprep.subr.bf16.mxu1 %v916_v17 }
  0x19   :  { %624 = vperm.xlu1 %909, %v546_v21   ;;  %619 = vperm.xlu0 %908, %v545_v22  }
  0x1b   :  { %856 = vmatpush3.bf16.msra.mxu0 %v916_v17  ;;  %905 = vmatpush3.bf16.msra.mxu1 %v916_v17 }
  0x1c   :  { %857 = vmatprep.subr.bf16.mxu0 %v917_v20  ;;  %898 = vmatprep.subr.bf16.mxu1 %v917_v20 }
  0x1d   :  { %634 = vperm.xlu1 %909, %v548_v25   ;;  %629 = vperm.xlu0 %908, %v547_v26  }
  0x1f   :  { %858 = vmatpush3.bf16.msra.mxu0 %v917_v20  ;;  %906 = vmatpush3.bf16.msra.mxu1 %v917_v20 }
  0x21   :  { %644 = vperm.xlu1 %909, %v550_v29   ;;  %639 = vperm.xlu0 %908, %v549_v30  }
  0x22   :  { %860 = vmatmul.mubr.bf16.vlgmr.msra.gmra.mrb[0].mxu0 %v920_v23  ;;  %876 = vmatmul.mubr.bf16.vlgmr.msra.gmra.mrb[0].mxu1 %v921_v24 }
  0x23   :  { %863 = vmatprep.mubr.bf16.mxu0 %v922_v27  ;;  %879 = vmatprep.mubr.bf16.mxu1 %v923_v28 }
  0x25   :  { %654 = vperm.xlu1 %909, %v552_v33   ;;  %649 = vperm.xlu0 %908, %v551_v34  }
  0x29   :  { %664 = vperm.xlu1 %909, %v554_v37   ;;  %659 = vperm.xlu0 %908, %v553_v38  }
  0x2a   :  { %864 = vmatmul.mubr.bf16.gmra.mrb[4].mxu0 %v924_v31  ;;  %880 = vmatmul.mubr.bf16.gmra.mrb[4].mxu1 %v925_v32 }
  0x2b   :  { %867 = vmatprep.mubr.bf16.mxu0 %v926_v35  ;;  %883 = vmatprep.mubr.bf16.mxu1 %v927_v36 }
  0x2d   :  { %674 = vperm.xlu1 %909, %v556_v41   ;;  %669 = vperm.xlu0 %908, %v555_v42  }
  0x31   :  { %684 = vperm.xlu1 %909, %v558_v45   ;;  %679 = vperm.xlu0 %908, %v557_v46  }
  0x32   :  { %868 = vmatmul.mubr.bf16.gmra.mrb[8].mxu0 %v928_v39  ;;  %884 = vmatmul.mubr.bf16.gmra.mrb[8].mxu1 %v929_v40 }
  0x33   :  { %871 = vmatprep.mubr.bf16.mxu0 %v930_v43  ;;  %887 = vmatprep.mubr.bf16.mxu1 %v931_v44 }
  0x35   :  { %694 = vperm.xlu1 %909, %v560_v49   ;;  %689 = vperm.xlu0 %908, %v559_v50  }
  0x39   :  { %704 = vperm.xlu1 %909, %v562_v51   ;;  %699 = vperm.xlu0 %908, %v561_v52  }
  0x3a   :  { %872 = vmatmul.mubr.bf16.gmra.mrb[12].mxu0 %v932_v47  ;;  %888 = vmatmul.mubr.bf16.gmra.mrb[12].mxu1 %v933_v48 }
  0x3d   :  { %714 = vperm.xlu1 %909, %v564_v53   ;;  %709 = vperm.xlu0 %908, %v563_v54  }
  0x41   :  { %724 = vperm.xlu1 %909, %v566_v55   ;;  %719 = vperm.xlu0 %908, %v565_v56  }
  0x84   :  { %v580_v57 = vpop.permute.xlu1 %579  ;;  %v570_v58 = vpop.permute.xlu0 %569 }
  0x88   :  { %v585_v59 = vpop.permute.xlu1 %584  ;;  %v575_v60 = vpop.permute.xlu0 %574 }
  0x8c   :  { %v1123_v61 = vpop.permute.xlu1 %594  ;;  %v590_v62 = vpop.permute.xlu0 %589 }
  0x90   :  { %v605_v63 = vpop.permute.xlu1 %604  ;;  %v600_v0 = vpop.permute.xlu0 %599 }
  0x94   :  { %v1125_v1 = vpop.permute.xlu1 %614  ;;  %v1127_v2 = vpop.permute.xlu0 %609 }
  0x98   :  { %v1129_v3 = vpop.permute.xlu1 %624  ;;  %v1131_v4 = vpop.permute.xlu0 %619 }
  0x9c   :  { %v1133_v5 = vpop.permute.xlu1 %634  ;;  %v1135_v6 = vpop.permute.xlu0 %629 }
  0xa0   :  { %v1137_v7 = vpop.permute.xlu1 %644  ;;  %v1139_v8 = vpop.permute.xlu0 %639 }
  0xa4   :  { %v655_v9 = vpop.permute.xlu1 %654  ;;  %v650_v10 = vpop.permute.xlu0 %649 }
  0xa8   :  { %v665_v11 = vpop.permute.xlu1 %664  ;;  %v660_v12 = vpop.permute.xlu0 %659 }
  0xac   :  { %v675_v13 = vpop.permute.xlu1 %674  ;;  %v670_v14 = vpop.permute.xlu0 %669 }
  0xb0   :  { %v685_v15 = vpop.permute.xlu1 %684  ;;  %v680_v16 = vpop.permute.xlu0 %679 }
  0xb4   :  { %v1141_v17 = vpop.permute.xlu1 %694  ;;  %v690_v18 = vpop.permute.xlu0 %689 }
  0xb8   :  { %v705_v35 = vpop.permute.xlu1 %704  ;;  %v700_v36 = vpop.permute.xlu0 %699 }
  0xbc   :  { %v715_v53 = vpop.permute.xlu1 %714  ;;  %v710_v54 = vpop.permute.xlu0 %709 }
  0xf5   :  { %v861_v19 = vpop.f32.mrb[0].mxu0  ;;  %v877_v20 = vpop.f32.mrb[0].mxu1 }
  0xf6   :  { %v729_v21 = vadd.f32 %v861_v19, %v580_v57  ;;  %v745_v22 = vadd.f32 %v877_v20, %v660_v12  ;;  %v309_v23 = vpop.f32.mrb[1].mxu0  ;;  %v373_v24 = vpop.f32.mrb[1].mxu1 }
  0xf7   :  { %v727_v25 = vadd.f32 %v570_v58, %v309_v23  ;;  %v743_v26 = vadd.f32 %v650_v10, %v373_v24  ;;  %v862_v27 = vpop.f32.mrb[2].mxu0  ;;  %v878_v28 = vpop.f32.mrb[2].mxu1 }
  0xf8   :  { %761 = vst [vmem:[%s1252_s3 + $0x10] sm:$0xff] %v729_v21  ;;  %777 = vst [vmem:[%s1252_s3 + $0x90] sm:$0xff] %v745_v22  ;;  %v730_v29 = vadd.f32 %v862_v27, %v585_v59  ;;  %v746_v30 = vadd.f32 %v878_v28, %v665_v11  ;;  %v312_v31 = vpop.f32.mrb[3].mxu0  ;;  %v376_v32 = vpop.f32.mrb[3].mxu1 }
  0xf9   :  { %759 = vst [vmem:[%s1252_s3] sm:$0xff] %v727_v25  ;;  %775 = vst [vmem:[%s1252_s3 + $0x80] sm:$0xff] %v743_v26  ;;  %v728_v33 = vadd.f32 %v575_v60, %v312_v31  ;;  %v744_v34 = vadd.f32 %v655_v9, %v376_v32 }
  0xfa   :  { %762 = vst [vmem:[%s1252_s3 + $0x18] sm:$0xff] %v730_v29  ;;  %778 = vst [vmem:[%s1252_s3 + $0x98] sm:$0xff] %v746_v30 }
  0xfb   :  { %760 = vst [vmem:[%s1252_s3 + $0x8] sm:$0xff] %v728_v33  ;;  %776 = vst [vmem:[%s1252_s3 + $0x88] sm:$0xff] %v744_v34 }
  0xfd   :  { %v865_v37 = vpop.f32.mrb[4].mxu0  ;;  %v881_v38 = vpop.f32.mrb[4].mxu1 }
  0xfe   :  { %v733_v39 = vadd.f32 %v865_v37, %v600_v0  ;;  %v749_v40 = vadd.f32 %v881_v38, %v680_v16  ;;  %v325_v41 = vpop.f32.mrb[5].mxu0  ;;  %v389_v42 = vpop.f32.mrb[5].mxu1 }
  0xff   :  { %v731_v43 = vadd.f32 %v590_v62, %v325_v41  ;;  %v747_v44 = vadd.f32 %v670_v14, %v389_v42  ;;  %v866_v45 = vpop.f32.mrb[6].mxu0  ;;  %v882_v46 = vpop.f32.mrb[6].mxu1 }
 0x100   :  { %765 = vst [vmem:[%s1252_s3 + $0x30] sm:$0xff] %v733_v39  ;;  %781 = vst [vmem:[%s1252_s3 + $0xb0] sm:$0xff] %v749_v40  ;;  %v734_v47 = vadd.f32 %v866_v45, %v605_v63  ;;  %v750_v48 = vadd.f32 %v882_v46, %v685_v15  ;;  %v328_v49 = vpop.f32.mrb[7].mxu0  ;;  %v392_v50 = vpop.f32.mrb[7].mxu1 }
 0x101   :  { %763 = vst [vmem:[%s1252_s3 + $0x20] sm:$0xff] %v731_v43  ;;  %779 = vst [vmem:[%s1252_s3 + $0xa0] sm:$0xff] %v747_v44  ;;  %v732_v51 = vadd.f32 %v1123_v61, %v328_v49  ;;  %v748_v52 = vadd.f32 %v675_v13, %v392_v50 }
 0x102   :  { %766 = vst [vmem:[%s1252_s3 + $0x38] sm:$0xff] %v734_v47  ;;  %782 = vst [vmem:[%s1252_s3 + $0xb8] sm:$0xff] %v750_v48 }
 0x103   :  { %764 = vst [vmem:[%s1252_s3 + $0x28] sm:$0xff] %v732_v51  ;;  %780 = vst [vmem:[%s1252_s3 + $0xa8] sm:$0xff] %v748_v52 }
 0x105   :  { %v869_v55 = vpop.f32.mrb[8].mxu0  ;;  %v885_v56 = vpop.f32.mrb[8].mxu1 }
 0x106   :  { %v737_v57 = vadd.f32 %v869_v55, %v1131_v4  ;;  %v753_v58 = vadd.f32 %v885_v56, %v700_v36  ;;  %v341_v59 = vpop.f32.mrb[9].mxu0  ;;  %v405_v60 = vpop.f32.mrb[9].mxu1 }
 0x107   :  { %v735_v61 = vadd.f32 %v1127_v2, %v341_v59  ;;  %v751_v62 = vadd.f32 %v690_v18, %v405_v60  ;;  %v870_v63 = vpop.f32.mrb[10].mxu0  ;;  %v886_v0 = vpop.f32.mrb[10].mxu1 }
 0x108   :  { %769 = vst [vmem:[%s1252_s3 + $0x50] sm:$0xff] %v737_v57  ;;  %785 = vst [vmem:[%s1252_s3 + $0xd0] sm:$0xff] %v753_v58  ;;  %v738_v9 = vadd.f32 %v870_v63, %v1129_v3  ;;  %v754_v10 = vadd.f32 %v886_v0, %v705_v35  ;;  %v344_v4 = vpop.f32.mrb[11].mxu0  ;;  %v408_v11 = vpop.f32.mrb[11].mxu1 }
 0x109   :  { %767 = vst [vmem:[%s1252_s3 + $0x40] sm:$0xff] %v735_v61  ;;  %783 = vst [vmem:[%s1252_s3 + $0xc0] sm:$0xff] %v751_v62  ;;  %v736_v2 = vadd.f32 %v1125_v1, %v344_v4  ;;  %v752_v12 = vadd.f32 %v1141_v17, %v408_v11  ;;  %v725_v3 = vpop.permute.xlu1 %724  ;;  %v720_v1 = vpop.permute.xlu0 %719 }
 0x10a   :  { %770 = vst [vmem:[%s1252_s3 + $0x58] sm:$0xff] %v738_v9  ;;  %786 = vst [vmem:[%s1252_s3 + $0xd8] sm:$0xff] %v754_v10 }
 0x10b   :  { %768 = vst [vmem:[%s1252_s3 + $0x48] sm:$0xff] %v736_v2  ;;  %784 = vst [vmem:[%s1252_s3 + $0xc8] sm:$0xff] %v752_v12 }
 0x10d   :  { %v873_v13 = vpop.f32.mrb[12].mxu0  ;;  %v889_v14 = vpop.f32.mrb[12].mxu1 }
 0x10e   :  { %v741_v15 = vadd.f32 %v873_v13, %v1139_v8  ;;  %v757_v16 = vadd.f32 %v889_v14, %v720_v1  ;;  %v357_v17 = vpop.f32.mrb[13].mxu0  ;;  %v421_v18 = vpop.f32.mrb[13].mxu1 }
 0x10f   :  { %v739_v19 = vadd.f32 %v1135_v6, %v357_v17  ;;  %v755_v20 = vadd.f32 %v710_v54, %v421_v18  ;;  %v874_v21 = vpop.f32.mrb[14].mxu0  ;;  %v890_v22 = vpop.f32.mrb[14].mxu1 }
 0x110   :  { %773 = vst [vmem:[%s1252_s3 + $0x70] sm:$0xff] %v741_v15  ;;  %789 = vst [vmem:[%s1252_s3 + $0xf0] sm:$0xff] %v757_v16  ;;  %v742_v23 = vadd.f32 %v874_v21, %v1137_v7  ;;  %v758_v24 = vadd.f32 %v890_v22, %v725_v3  ;;  %v360_v8 = vpop.f32.mrb[15].mxu0  ;;  %v424_v25 = vpop.f32.mrb[15].mxu1 }
 0x111   :  { %771 = vst [vmem:[%s1252_s3 + $0x60] sm:$0xff] %v739_v19  ;;  %787 = vst [vmem:[%s1252_s3 + $0xe0] sm:$0xff] %v755_v20  ;;  %v740_v6 = vadd.f32 %v1133_v5, %v360_v8  ;;  %v756_v26 = vadd.f32 %v715_v53, %v424_v25 }
 0x112   :  { %774 = vst [vmem:[%s1252_s3 + $0x78] sm:$0xff] %v742_v23  ;;  %790 = vst [vmem:[%s1252_s3 + $0xf8] sm:$0xff] %v758_v24 }
 0x113   :  { %772 = vst [vmem:[%s1252_s3 + $0x68] sm:$0xff] %v740_v6  ;;  %788 = vst [vmem:[%s1252_s3 + $0xe8] sm:$0xff] %v756_v26 }

// kernel: conv_vae_forward.9
= control target key start
LH: loop header
LB: loop body
LE: loop exit
PB: predicated region body
PF: predicated region fallthrough
CT: control target
= control target key end

     0   :  { %v370_v1 = vmov 0   ;;  %s475_s1 = inlined_call_operand.vmem [shape: bf16[128,128], index: 1, kind: input, shape index: {}]   ;;  %s476_s0 = inlined_call_operand.vmem [shape: bf16[64,128], index: 0, kind: input, shape index: {}]   ;;  %s477_s2 = inlined_call_operand.vmem [shape: f32[64,1], index: 2, kind: input, shape index: {}]   ;;  %s478_s3 = inlined_call_operand.vmem [shape: f32[64,128], index: 3, kind: output, shape index: {}]  }
   0x1   :  { %v358_v0 = vld [vmem:[%s475_s1] sm:$0xff]   ;;  %357 = vset.pattern.permute.xlu1 %v370_v1  ;;  %356 = vset.pattern.permute.xlu0 %v370_v1  ;;  %v359_v2 = vld [vmem:[%s475_s1 + $0x8] sm:$0xff]   ;;  %v360_v3 = vld [vmem:[%s475_s1 + $0x10] sm:$0xff]  }
   0x2   :  { %315 = vmatprep.subr.bf16.mxu0 %v358_v0  ;;  %339 = vmatprep.subr.bf16.mxu1 %v358_v0  ;;  %v361_v4 = vld [vmem:[%s475_s1 + $0x18] sm:$0xff]   ;;  %v366_v5 = vld [vmem:[%s476_s0] sm:$0xff]   ;;  %v367_v6 = vld [vmem:[%s476_s0 + $0x10] sm:$0xff]  }
   0x3   :  { %316 = vmatpush3.bf16.msra.mxu0 %v358_v0  ;;  %347 = vmatpush3.bf16.msra.mxu1 %v358_v0  ;;  %v362_v7 = vld [vmem:[%s475_s1 + $0x20] sm:$0xff]   ;;  %v225_v8 = vld [vmem:[%s477_s2 + $0x10] sm:$0xff]  ;;  %v226_v10 = vld [vmem:[%s477_s2 + $0x18] sm:$0xff] }
   0x4   :  { %317 = vmatprep.subr.bf16.mxu0 %v359_v2  ;;  %340 = vmatprep.subr.bf16.mxu1 %v359_v2  ;;  %v223_v9 = vld [vmem:[%s477_s2] sm:$0xff]  ;;  %v224_v11 = vld [vmem:[%s477_s2 + $0x8] sm:$0xff]  ;;  %v364_v15 = vld [vmem:[%s475_s1 + $0x30] sm:$0xff]  }
   0x5   :  { %331 = vmatprep.mubr.bf16.mxu0 %v366_v5  ;;  %335 = vmatprep.mubr.bf16.mxu1 %v367_v6  ;;  %v363_v12 = vld [vmem:[%s475_s1 + $0x28] sm:$0xff]   ;;  %v227_v14 = vld [vmem:[%s477_s2 + $0x20] sm:$0xff]  ;;  %v230_v16 = vld [vmem:[%s477_s2 + $0x38] sm:$0xff] }
   0x6   :  { %243 = vperm.xlu1 %357, %v225_v8   ;;  %233 = vperm.xlu0 %356, %v223_v9   ;;  %v228_v13 = vld [vmem:[%s477_s2 + $0x28] sm:$0xff]  ;;  %v229_v17 = vld [vmem:[%s477_s2 + $0x30] sm:$0xff]  ;;  %v365_v18 = vld [vmem:[%s475_s1 + $0x38] sm:$0xff]  }
   0x7   :  { %318 = vmatpush3.bf16.msra.mxu0 %v359_v2  ;;  %348 = vmatpush3.bf16.msra.mxu1 %v359_v2  ;;  %v368_v19 = vld [vmem:[%s476_s0 + $0x8] sm:$0xff]   ;;  %v369_v20 = vld [vmem:[%s476_s0 + $0x18] sm:$0xff]  }
   0x8   :  { %319 = vmatprep.subr.bf16.mxu0 %v360_v3  ;;  %341 = vmatprep.subr.bf16.mxu1 %v360_v3 }
   0xa   :  { %248 = vperm.xlu1 %357, %v226_v10   ;;  %238 = vperm.xlu0 %356, %v224_v11  }
   0xb   :  { %320 = vmatpush3.bf16.msra.mxu0 %v360_v3  ;;  %349 = vmatpush3.bf16.msra.mxu1 %v360_v3 }
   0xc   :  { %321 = vmatprep.subr.bf16.mxu0 %v361_v4  ;;  %342 = vmatprep.subr.bf16.mxu1 %v361_v4 }
   0xe   :  { %258 = vperm.xlu1 %357, %v228_v13   ;;  %253 = vperm.xlu0 %356, %v227_v14  }
   0xf   :  { %322 = vmatpush3.bf16.msra.mxu0 %v361_v4  ;;  %350 = vmatpush3.bf16.msra.mxu1 %v361_v4 }
  0x10   :  { %323 = vmatprep.subr.bf16.mxu0 %v362_v7  ;;  %343 = vmatprep.subr.bf16.mxu1 %v362_v7 }
  0x12   :  { %268 = vperm.xlu1 %357, %v230_v16   ;;  %263 = vperm.xlu0 %356, %v229_v17  }
  0x13   :  { %324 = vmatpush3.bf16.msra.mxu0 %v362_v7  ;;  %351 = vmatpush3.bf16.msra.mxu1 %v362_v7 }
  0x14   :  { %325 = vmatprep.subr.bf16.mxu0 %v363_v12  ;;  %344 = vmatprep.subr.bf16.mxu1 %v363_v12 }
  0x17   :  { %326 = vmatpush3.bf16.msra.mxu0 %v363_v12  ;;  %352 = vmatpush3.bf16.msra.mxu1 %v363_v12 }
  0x18   :  { %327 = vmatprep.subr.bf16.mxu0 %v364_v15  ;;  %345 = vmatprep.subr.bf16.mxu1 %v364_v15 }
  0x1b   :  { %328 = vmatpush3.bf16.msra.mxu0 %v364_v15  ;;  %353 = vmatpush3.bf16.msra.mxu1 %v364_v15 }
  0x1c   :  { %329 = vmatprep.subr.bf16.mxu0 %v365_v18  ;;  %346 = vmatprep.subr.bf16.mxu1 %v365_v18 }
  0x1f   :  { %330 = vmatpush3.bf16.msra.mxu0 %v365_v18  ;;  %354 = vmatpush3.bf16.msra.mxu1 %v365_v18 }
  0x22   :  { %332 = vmatmul.mubr.bf16.vlgmr.msra.gmra.mrb[0].mxu0 %v368_v19  ;;  %336 = vmatmul.mubr.bf16.vlgmr.msra.gmra.mrb[0].mxu1 %v369_v20 }
  0x85   :  { %v244_v21 = vpop.permute.xlu1 %243  ;;  %v234_v22 = vpop.permute.xlu0 %233 }
  0x89   :  { %v249_v23 = vpop.permute.xlu1 %248  ;;  %v239_v24 = vpop.permute.xlu0 %238 }
  0x8d   :  { %v259_v25 = vpop.permute.xlu1 %258  ;;  %v254_v26 = vpop.permute.xlu0 %253 }
  0x91   :  { %v269_v27 = vpop.permute.xlu1 %268  ;;  %v264_v28 = vpop.permute.xlu0 %263 }
  0xf5   :  { %v333_v29 = vpop.f32.mrb[0].mxu0  ;;  %v337_v30 = vpop.f32.mrb[0].mxu1 }
  0xf6   :  { %v273_v31 = vadd.f32 %v333_v29, %v244_v21  ;;  %v277_v32 = vadd.f32 %v337_v30, %v264_v28  ;;  %v165_v33 = vpop.f32.mrb[1].mxu0  ;;  %v181_v34 = vpop.f32.mrb[1].mxu1 }
  0xf7   :  { %v271_v35 = vadd.f32 %v234_v22, %v165_v33  ;;  %v275_v36 = vadd.f32 %v254_v26, %v181_v34  ;;  %v334_v37 = vpop.f32.mrb[2].mxu0  ;;  %v338_v38 = vpop.f32.mrb[2].mxu1 }
  0xf8   :  { %281 = vst [vmem:[%s478_s3 + $0x10] sm:$0xff] %v273_v31  ;;  %285 = vst [vmem:[%s478_s3 + $0x30] sm:$0xff] %v277_v32  ;;  %v274_v39 = vadd.f32 %v334_v37, %v249_v23  ;;  %v278_v40 = vadd.f32 %v338_v38, %v269_v27  ;;  %v168_v41 = vpop.f32.mrb[3].mxu0  ;;  %v184_v42 = vpop.f32.mrb[3].mxu1 }
  0xf9   :  { %279 = vst [vmem:[%s478_s3] sm:$0xff] %v271_v35  ;;  %283 = vst [vmem:[%s478_s3 + $0x20] sm:$0xff] %v275_v36  ;;  %v272_v43 = vadd.f32 %v239_v24, %v168_v41  ;;  %v276_v44 = vadd.f32 %v259_v25, %v184_v42 }
  0xfa   :  { %282 = vst [vmem:[%s478_s3 + $0x18] sm:$0xff] %v274_v39  ;;  %286 = vst [vmem:[%s478_s3 + $0x38] sm:$0xff] %v278_v40 }
  0xfb   :  { %280 = vst [vmem:[%s478_s3 + $0x8] sm:$0xff] %v272_v43  ;;  %284 = vst [vmem:[%s478_s3 + $0x28] sm:$0xff] %v276_v44 }

</bundles_post_ra>
